<compile_context>
chip_gen: v6e
topology: v6e:2x2x1
jax: 0.10.0
libtpu: 0.0.40
codegen_flags: <defaults>
</compile_context>

<pallas_src>
import math

import jax
import jax.numpy as jnp
from jax import lax
from jax.experimental import pallas as pl
from jax.experimental.pallas import tpu as pltpu


def _gelu(x):
    # exact (erf-based) GELU, matching torch.nn.GELU(approximate='none')
    return 0.5 * x * (1.0 + lax.erf(x * 0.7071067811865476))


# ------------------------------------------------------------------ kernels

def gin_bn_score_kernel(a_ref, xn_ref, xs_ref, w1_ref, w2_ref, p_ref,
                        h_ref, s_ref):
    """Fused GINConv(MLP) -> GELU -> BatchNorm(batch stats) -> TopKPooling score.

    a_ref : [M, N] dense aggregation matrix (rows = output nodes)
    xn_ref: [N, F] neighbour features (mask/score-scaled for layer 2)
    xs_ref: [M, F] self features of the output nodes
    p_ref : [5, H] packed params: b1, b2, bn_gamma, bn_beta, pool_weight
    """
    p = p_ref[...]
    agg = jnp.dot(a_ref[...], xn_ref[...], preferred_element_type=jnp.float32)
    h = agg + xs_ref[...]                                   # (1 + eps) * x_i, eps = 0
    h = jnp.dot(h, w1_ref[...], preferred_element_type=jnp.float32) + p[0:1, :]
    h = _gelu(h)                                            # MLP inner activation
    h = jnp.dot(h, w2_ref[...], preferred_element_type=jnp.float32) + p[1:2, :]
    h = _gelu(h)                                            # outer self.activation
    mean = jnp.mean(h, axis=0, keepdims=True)
    var = jnp.mean((h - mean) ** 2, axis=0, keepdims=True)  # biased var (BN train)
    h = (h - mean) * lax.rsqrt(var + 1e-5) * p[2:3, :] + p[3:4, :]
    h_ref[...] = h
    pw = p[4:5, :]                                          # TopKPooling weight
    s = jnp.sum(h * pw, axis=-1, keepdims=True)
    norm = jnp.sqrt(jnp.sum(pw * pw))
    s_ref[...] = jnp.tanh(s / norm)


def tail_kernel(x1_ref, x2_ref, w_ref, b_ref, o_ref):
    """cat([gmp, gap]) for both pooled layers, add, final Linear — one kernel.

    (x1 + x2) @ W == (max1 + max2) @ W[:H] + (mean1 + mean2) @ W[H:]
    (avoids an in-kernel concatenate).
    """
    a = x1_ref[...]                                         # [G, K1, H]
    b = x2_ref[...]                                         # [G, K2, H]
    hdim = a.shape[-1]
    mx = jnp.max(a, axis=1) + jnp.max(b, axis=1)            # gmp1 + gmp2
    mn = jnp.mean(a, axis=1) + jnp.mean(b, axis=1)          # gap1 + gap2
    o_ref[...] = (jnp.dot(mx, w_ref[:hdim, :], preferred_element_type=jnp.float32)
                  + jnp.dot(mn, w_ref[hdim:, :], preferred_element_type=jnp.float32)
                  + b_ref[...])


# ------------------------------------------------------------------ wrappers

_VMEM = pl.BlockSpec(memory_space=pltpu.MemorySpace.VMEM)


def gin_bn_score(a, xn, xs, w1, w2, params):
    m = xs.shape[0]
    h = w2.shape[1]
    return pl.pallas_call(
        gin_bn_score_kernel,
        out_shape=(jax.ShapeDtypeStruct((m, h), jnp.float32),
                   jax.ShapeDtypeStruct((m, 1), jnp.float32)),
        in_specs=[_VMEM] * 6,
        out_specs=(_VMEM, _VMEM),
    )(a, xn, xs, w1, w2, params)


def tail(xp1_3d, xp2_3d, wl, bl):
    g = xp1_3d.shape[0]
    return pl.pallas_call(
        tail_kernel,
        out_shape=jax.ShapeDtypeStruct((g, wl.shape[1]), jnp.float32),
        in_specs=[_VMEM] * 4,
        out_specs=_VMEM,
    )(xp1_3d, xp2_3d, wl, bl)


def make_forward(G, NPG, ratio, H):
    k1 = int(math.ceil(ratio * NPG))
    k2 = int(math.ceil(ratio * k1))

    @jax.jit
    def forward(A, x, w11, w12, P1, w21, w22, P2, wl, bl):
        N = A.shape[0]

        # ---- layer 1: GIN + GELU + BN + TopK score (one pallas_call) ----
        h1, s1c = gin_bn_score(A, x, x, w11, w12, P1)
        s1 = s1c[:, 0]
        top1, idx1 = lax.top_k(s1.reshape(G, NPG), k1)          # per-graph top-k
        perm1 = (idx1 + jnp.arange(G)[:, None] * NPG).reshape(-1)
        m1 = jnp.zeros((N,), jnp.float32).at[perm1].set(top1.reshape(-1))
        xm1 = h1 * m1[:, None]        # mask & score-scale all N nodes (dropped -> 0)
        xp1 = xm1[perm1]              # pooled node features = h1[perm] * s1[perm]
        a_rows = A[perm1]             # only an O(K*N) row gather — no N^2 gather

        # ---- layer 2 (uses A[perm] @ (mask*s*h1) == filtered-adj aggregation) ----
        h2, s2c = gin_bn_score(a_rows, xm1, xp1, w21, w22, P2)
        s2 = s2c[:, 0]
        top2, idx2 = lax.top_k(s2.reshape(G, k1), k2)
        perm2 = (idx2 + jnp.arange(G)[:, None] * k1).reshape(-1)
        xp2 = h2[perm2] * top2.reshape(-1)[:, None]

        # ---- fused tail: gmp/gap pools + add + linear (one pallas_call) ----
        return tail(xp1.reshape(G, k1, H), xp2.reshape(G, k2, H), wl, bl)

    return forward, k1, k2


# ------------------------------------------------------------------ main

if __name__ == "__main__":
    G, NPG = 2, 32                 # 2 graphs, 32 nodes each
    N = G * NPG
    F_IN, H, F_OUT = 16, 32, 32    # in_features, hidden_features, out_features
    E_PER_G = 128
    RATIO = 0.5

    key = jax.random.PRNGKey(0)
    ks = jax.random.split(key, 10)

    # data.x, data.edge_index, data.batch
    x = jax.random.normal(ks[0], (N, F_IN), jnp.float32)
    src = jax.random.randint(ks[1], (G, E_PER_G), 0, NPG) + jnp.arange(G)[:, None] * NPG
    dst = jax.random.randint(ks[2], (G, E_PER_G), 0, NPG) + jnp.arange(G)[:, None] * NPG
    edge_index = jnp.stack([src.reshape(-1), dst.reshape(-1)])          # [2, E]
    # dense adjacency: A[dst, src] counts edges src -> dst (GIN 'add' aggregation)
    A = jnp.zeros((N, N), jnp.float32).at[edge_index[1], edge_index[0]].add(1.0)

    def lin_init(k, fan_in, fan_out):
        kw, kb = jax.random.split(k)
        bound = 1.0 / math.sqrt(fan_in)
        w = jax.random.uniform(kw, (fan_in, fan_out), jnp.float32, -bound, bound)
        b = jax.random.uniform(kb, (1, fan_out), jnp.float32, -bound, bound)
        return w, b

    # conv1 MLP, bn1, pool1
    w11, b11 = lin_init(ks[3], F_IN, H)
    w12, b12 = lin_init(ks[4], H, H)
    gamma1, beta1 = jnp.ones((1, H), jnp.float32), jnp.zeros((1, H), jnp.float32)
    pw1 = jax.random.uniform(ks[5], (1, H), jnp.float32,
                             -1.0 / math.sqrt(H), 1.0 / math.sqrt(H))
    # conv2 MLP, bn2, pool2
    w21, b21 = lin_init(ks[6], H, H)
    w22, b22 = lin_init(ks[7], H, H)
    gamma2, beta2 = jnp.ones((1, H), jnp.float32), jnp.zeros((1, H), jnp.float32)
    pw2 = jax.random.uniform(ks[8], (1, H), jnp.float32,
                             -1.0 / math.sqrt(H), 1.0 / math.sqrt(H))
    # final linear
    wl, bl = lin_init(ks[9], 2 * H, F_OUT)

    # packed per-layer [5, H] parameter blocks: b1, b2, gamma, beta, pool weight
    P1 = jnp.concatenate([b11, b12, gamma1, beta1, pw1], axis=0)
    P2 = jnp.concatenate([b21, b22, gamma2, beta2, pw2], axis=0)

    forward, k1, k2 = make_forward(G, NPG, RATIO, H)
    out = forward(A, x, w11, w12, P1, w21, w22, P2, wl, bl)
    jax.block_until_ready(out)
    assert out.shape == (G, F_OUT)
    print("KERNEL_OK")
</pallas_src>

<mosaic_0001>
module attributes {stable_mosaic.version = 11 : i64} {
  func.func @gin_bn_score_kernel(%arg0: memref<64x64xf32, #tpu.memory_space<vmem>>, %arg1: memref<64x16xf32, #tpu.memory_space<vmem>>, %arg2: memref<64x16xf32, #tpu.memory_space<vmem>>, %arg3: memref<16x32xf32, #tpu.memory_space<vmem>>, %arg4: memref<32x32xf32, #tpu.memory_space<vmem>>, %arg5: memref<5x32xf32, #tpu.memory_space<vmem>>, %arg6: memref<64x32xf32, #tpu.memory_space<vmem>>, %arg7: memref<64x1xf32, #tpu.memory_space<vmem>>) attributes {dimension_semantics = [], scalar_prefetch = 0 : i64, scratch_operands = 0 : i64, tpu.core_type = #tpu.core_type<tc>} {
    %c0 = arith.constant 0 : index
    %c0_0 = arith.constant 0 : index
    %0 = vector.load %arg5[%c0, %c0_0] : memref<5x32xf32, #tpu.memory_space<vmem>>, vector<5x32xf32>
    %c0_1 = arith.constant 0 : index
    %c0_2 = arith.constant 0 : index
    %1 = vector.load %arg0[%c0_1, %c0_2] : memref<64x64xf32, #tpu.memory_space<vmem>>, vector<64x64xf32>
    %c0_3 = arith.constant 0 : index
    %c0_4 = arith.constant 0 : index
    %2 = vector.load %arg1[%c0_3, %c0_4] : memref<64x16xf32, #tpu.memory_space<vmem>>, vector<64x16xf32>
    %cst = arith.constant dense<0.000000e+00> : vector<64x16xf32>
    %3 = tpu.matmul %1, %2, %cst {dimension_numbers = #tpu.dot_dimension_numbers<[1], [0], [0], [1], [0, 0, 1, 1], [], []>} : vector<64x64xf32>, vector<64x16xf32>, vector<64x16xf32> -> vector<64x16xf32>
    %c0_5 = arith.constant 0 : index
    %c0_6 = arith.constant 0 : index
    %4 = vector.load %arg2[%c0_5, %c0_6] : memref<64x16xf32, #tpu.memory_space<vmem>>, vector<64x16xf32>
    %5 = arith.addf %3, %4 : vector<64x16xf32>
    %c0_7 = arith.constant 0 : index
    %c0_8 = arith.constant 0 : index
    %6 = vector.load %arg3[%c0_7, %c0_8] : memref<16x32xf32, #tpu.memory_space<vmem>>, vector<16x32xf32>
    %cst_9 = arith.constant dense<0.000000e+00> : vector<64x32xf32>
    %7 = tpu.matmul %5, %6, %cst_9 {dimension_numbers = #tpu.dot_dimension_numbers<[1], [0], [0], [1], [0, 0, 1, 1], [], []>} : vector<64x16xf32>, vector<16x32xf32>, vector<64x32xf32> -> vector<64x32xf32>
    %8 = vector.extract_strided_slice %0 {offsets = [0, 0], sizes = [1, 32], strides = [1, 1]} : vector<5x32xf32> to vector<1x32xf32>
    %9 = vector.broadcast %8 : vector<1x32xf32> to vector<64x32xf32>
    %10 = arith.addf %7, %9 : vector<64x32xf32>
    %cst_10 = arith.constant 5.000000e-01 : f32
    %11 = vector.broadcast %cst_10 : f32 to vector<64x32xf32>
    %12 = arith.mulf %11, %10 : vector<64x32xf32>
    %cst_11 = arith.constant 0.707106769 : f32
    %13 = vector.broadcast %cst_11 : f32 to vector<64x32xf32>
    %14 = arith.mulf %10, %13 : vector<64x32xf32>
    %15 = math.erf %14 : vector<64x32xf32>
    %cst_12 = arith.constant 1.000000e+00 : f32
    %16 = vector.broadcast %cst_12 : f32 to vector<64x32xf32>
    %17 = arith.addf %16, %15 : vector<64x32xf32>
    %18 = arith.mulf %12, %17 : vector<64x32xf32>
    %c0_13 = arith.constant 0 : index
    %c0_14 = arith.constant 0 : index
    %19 = vector.load %arg4[%c0_13, %c0_14] : memref<32x32xf32, #tpu.memory_space<vmem>>, vector<32x32xf32>
    %cst_15 = arith.constant dense<0.000000e+00> : vector<64x32xf32>
    %20 = tpu.matmul %18, %19, %cst_15 {dimension_numbers = #tpu.dot_dimension_numbers<[1], [0], [0], [1], [0, 0, 1, 1], [], []>} : vector<64x32xf32>, vector<32x32xf32>, vector<64x32xf32> -> vector<64x32xf32>
    %21 = vector.extract_strided_slice %0 {offsets = [1, 0], sizes = [1, 32], strides = [1, 1]} : vector<5x32xf32> to vector<1x32xf32>
    %22 = vector.broadcast %21 : vector<1x32xf32> to vector<64x32xf32>
    %23 = arith.addf %20, %22 : vector<64x32xf32>
    %cst_16 = arith.constant 5.000000e-01 : f32
    %24 = vector.broadcast %cst_16 : f32 to vector<64x32xf32>
    %25 = arith.mulf %24, %23 : vector<64x32xf32>
    %cst_17 = arith.constant 0.707106769 : f32
    %26 = vector.broadcast %cst_17 : f32 to vector<64x32xf32>
    %27 = arith.mulf %23, %26 : vector<64x32xf32>
    %28 = math.erf %27 : vector<64x32xf32>
    %cst_18 = arith.constant 1.000000e+00 : f32
    %29 = vector.broadcast %cst_18 : f32 to vector<64x32xf32>
    %30 = arith.addf %29, %28 : vector<64x32xf32>
    %31 = arith.mulf %25, %30 : vector<64x32xf32>
    %cst_19 = arith.constant dense<0.000000e+00> : vector<32xf32>
    %32 = vector.multi_reduction <add>, %31, %cst_19 [0] : vector<64x32xf32> to vector<32xf32>
    %33 = vector.shape_cast %32 : vector<32xf32> to vector<1x32xf32>
    %cst_20 = arith.constant 6.400000e+01 : f32
    %34 = vector.broadcast %cst_20 : f32 to vector<1x32xf32>
    %35 = arith.divf %33, %34 : vector<1x32xf32>
    %36 = vector.broadcast %35 : vector<1x32xf32> to vector<64x32xf32>
    %37 = arith.subf %31, %36 : vector<64x32xf32>
    %38 = arith.mulf %37, %37 : vector<64x32xf32>
    %cst_21 = arith.constant dense<0.000000e+00> : vector<32xf32>
    %39 = vector.multi_reduction <add>, %38, %cst_21 [0] : vector<64x32xf32> to vector<32xf32>
    %40 = vector.shape_cast %39 : vector<32xf32> to vector<1x32xf32>
    %cst_22 = arith.constant 6.400000e+01 : f32
    %41 = vector.broadcast %cst_22 : f32 to vector<1x32xf32>
    %42 = arith.divf %40, %41 : vector<1x32xf32>
    %43 = vector.broadcast %35 : vector<1x32xf32> to vector<64x32xf32>
    %44 = arith.subf %31, %43 : vector<64x32xf32>
    %cst_23 = arith.constant 9.99999974E-6 : f32
    %45 = vector.broadcast %cst_23 : f32 to vector<1x32xf32>
    %46 = arith.addf %42, %45 : vector<1x32xf32>
    %47 = math.rsqrt %46 : vector<1x32xf32>
    %48 = vector.broadcast %47 : vector<1x32xf32> to vector<64x32xf32>
    %49 = arith.mulf %44, %48 : vector<64x32xf32>
    %50 = vector.extract_strided_slice %0 {offsets = [2, 0], sizes = [1, 32], strides = [1, 1]} : vector<5x32xf32> to vector<1x32xf32>
    %51 = vector.broadcast %50 : vector<1x32xf32> to vector<64x32xf32>
    %52 = arith.mulf %49, %51 : vector<64x32xf32>
    %53 = vector.extract_strided_slice %0 {offsets = [3, 0], sizes = [1, 32], strides = [1, 1]} : vector<5x32xf32> to vector<1x32xf32>
    %54 = vector.broadcast %53 : vector<1x32xf32> to vector<64x32xf32>
    %55 = arith.addf %52, %54 : vector<64x32xf32>
    %c0_24 = arith.constant 0 : index
    %c0_25 = arith.constant 0 : index
    %56 = vector.load %arg6[%c0_24, %c0_25] : memref<64x32xf32, #tpu.memory_space<vmem>>, vector<64x32xf32>
    tpu.vector_store %arg6[%c0_24, %c0_25], %55 {strides = array<i32>} : memref<64x32xf32, #tpu.memory_space<vmem>>, vector<64x32xf32>,
    %57 = vector.extract_strided_slice %0 {offsets = [4, 0], sizes = [1, 32], strides = [1, 1]} : vector<5x32xf32> to vector<1x32xf32>
    %58 = vector.broadcast %57 : vector<1x32xf32> to vector<64x32xf32>
    %59 = arith.mulf %55, %58 : vector<64x32xf32>
    %cst_26 = arith.constant dense<0.000000e+00> : vector<64xf32>
    %60 = vector.multi_reduction <add>, %59, %cst_26 [1] : vector<64x32xf32> to vector<64xf32>
    %61 = vector.shape_cast %60 : vector<64xf32> to vector<64x1xf32>
    %62 = arith.mulf %57, %57 : vector<1x32xf32>
    %63 = vector.shape_cast %62 : vector<1x32xf32> to vector<1x1x32xf32>
    %cst_27 = arith.constant dense<0.000000e+00> : vector<1xf32>
    %64 = vector.multi_reduction <add>, %63, %cst_27 [1, 2] : vector<1x1x32xf32> to vector<1xf32>
    %65 = vector.shape_cast %64 : vector<1xf32> to vector<1x1x1xf32>
    %66 = vector.extract %65[0, 0, 0] : f32 from vector<1x1x1xf32>
    %67 = math.sqrt %66 : f32
    %68 = vector.broadcast %67 : f32 to vector<64x1xf32>
    %69 = arith.divf %61, %68 : vector<64x1xf32>
    %70 = math.tanh %69 : vector<64x1xf32>
    %c0_28 = arith.constant 0 : index
    %c0_29 = arith.constant 0 : index
    %71 = vector.load %arg7[%c0_28, %c0_29] : memref<64x1xf32, #tpu.memory_space<vmem>>, vector<64x1xf32>
    tpu.vector_store %arg7[%c0_28, %c0_29], %70 {strides = array<i32>} : memref<64x1xf32, #tpu.memory_space<vmem>>, vector<64x1xf32>,
    return
  }
}

module attributes {stable_mosaic.version = 11 : i64} {
  func.func @gin_bn_score_kernel(%arg0: memref<32x64xf32, #tpu.memory_space<vmem>>, %arg1: memref<64x32xf32, #tpu.memory_space<vmem>>, %arg2: memref<32x32xf32, #tpu.memory_space<vmem>>, %arg3: memref<32x32xf32, #tpu.memory_space<vmem>>, %arg4: memref<32x32xf32, #tpu.memory_space<vmem>>, %arg5: memref<5x32xf32, #tpu.memory_space<vmem>>, %arg6: memref<32x32xf32, #tpu.memory_space<vmem>>, %arg7: memref<32x1xf32, #tpu.memory_space<vmem>>) attributes {dimension_semantics = [], scalar_prefetch = 0 : i64, scratch_operands = 0 : i64, tpu.core_type = #tpu.core_type<tc>} {
    %c0 = arith.constant 0 : index
    %c0_0 = arith.constant 0 : index
    %0 = vector.load %arg5[%c0, %c0_0] : memref<5x32xf32, #tpu.memory_space<vmem>>, vector<5x32xf32>
    %c0_1 = arith.constant 0 : index
    %c0_2 = arith.constant 0 : index
    %1 = vector.load %arg0[%c0_1, %c0_2] : memref<32x64xf32, #tpu.memory_space<vmem>>, vector<32x64xf32>
    %c0_3 = arith.constant 0 : index
    %c0_4 = arith.constant 0 : index
    %2 = vector.load %arg1[%c0_3, %c0_4] : memref<64x32xf32, #tpu.memory_space<vmem>>, vector<64x32xf32>
    %cst = arith.constant dense<0.000000e+00> : vector<32x32xf32>
    %3 = tpu.matmul %1, %2, %cst {dimension_numbers = #tpu.dot_dimension_numbers<[1], [0], [0], [1], [0, 0, 1, 1], [], []>} : vector<32x64xf32>, vector<64x32xf32>, vector<32x32xf32> -> vector<32x32xf32>
    %c0_5 = arith.constant 0 : index
    %c0_6 = arith.constant 0 : index
    %4 = vector.load %arg2[%c0_5, %c0_6] : memref<32x32xf32, #tpu.memory_space<vmem>>, vector<32x32xf32>
    %5 = arith.addf %3, %4 : vector<32x32xf32>
    %c0_7 = arith.constant 0 : index
    %c0_8 = arith.constant 0 : index
    %6 = vector.load %arg3[%c0_7, %c0_8] : memref<32x32xf32, #tpu.memory_space<vmem>>, vector<32x32xf32>
    %cst_9 = arith.constant dense<0.000000e+00> : vector<32x32xf32>
    %7 = tpu.matmul %5, %6, %cst_9 {dimension_numbers = #tpu.dot_dimension_numbers<[1], [0], [0], [1], [0, 0, 1, 1], [], []>} : vector<32x32xf32>, vector<32x32xf32>, vector<32x32xf32> -> vector<32x32xf32>
    %8 = vector.extract_strided_slice %0 {offsets = [0, 0], sizes = [1, 32], strides = [1, 1]} : vector<5x32xf32> to vector<1x32xf32>
    %9 = vector.broadcast %8 : vector<1x32xf32> to vector<32x32xf32>
    %10 = arith.addf %7, %9 : vector<32x32xf32>
    %cst_10 = arith.constant 5.000000e-01 : f32
    %11 = vector.broadcast %cst_10 : f32 to vector<32x32xf32>
    %12 = arith.mulf %11, %10 : vector<32x32xf32>
    %cst_11 = arith.constant 0.707106769 : f32
    %13 = vector.broadcast %cst_11 : f32 to vector<32x32xf32>
    %14 = arith.mulf %10, %13 : vector<32x32xf32>
    %15 = math.erf %14 : vector<32x32xf32>
    %cst_12 = arith.constant 1.000000e+00 : f32
    %16 = vector.broadcast %cst_12 : f32 to vector<32x32xf32>
    %17 = arith.addf %16, %15 : vector<32x32xf32>
    %18 = arith.mulf %12, %17 : vector<32x32xf32>
    %c0_13 = arith.constant 0 : index
    %c0_14 = arith.constant 0 : index
    %19 = vector.load %arg4[%c0_13, %c0_14] : memref<32x32xf32, #tpu.memory_space<vmem>>, vector<32x32xf32>
    %cst_15 = arith.constant dense<0.000000e+00> : vector<32x32xf32>
    %20 = tpu.matmul %18, %19, %cst_15 {dimension_numbers = #tpu.dot_dimension_numbers<[1], [0], [0], [1], [0, 0, 1, 1], [], []>} : vector<32x32xf32>, vector<32x32xf32>, vector<32x32xf32> -> vector<32x32xf32>
    %21 = vector.extract_strided_slice %0 {offsets = [1, 0], sizes = [1, 32], strides = [1, 1]} : vector<5x32xf32> to vector<1x32xf32>
    %22 = vector.broadcast %21 : vector<1x32xf32> to vector<32x32xf32>
    %23 = arith.addf %20, %22 : vector<32x32xf32>
    %cst_16 = arith.constant 5.000000e-01 : f32
    %24 = vector.broadcast %cst_16 : f32 to vector<32x32xf32>
    %25 = arith.mulf %24, %23 : vector<32x32xf32>
    %cst_17 = arith.constant 0.707106769 : f32
    %26 = vector.broadcast %cst_17 : f32 to vector<32x32xf32>
    %27 = arith.mulf %23, %26 : vector<32x32xf32>
    %28 = math.erf %27 : vector<32x32xf32>
    %cst_18 = arith.constant 1.000000e+00 : f32
    %29 = vector.broadcast %cst_18 : f32 to vector<32x32xf32>
    %30 = arith.addf %29, %28 : vector<32x32xf32>
    %31 = arith.mulf %25, %30 : vector<32x32xf32>
    %cst_19 = arith.constant dense<0.000000e+00> : vector<32xf32>
    %32 = vector.multi_reduction <add>, %31, %cst_19 [0] : vector<32x32xf32> to vector<32xf32>
    %33 = vector.shape_cast %32 : vector<32xf32> to vector<1x32xf32>
    %cst_20 = arith.constant 3.200000e+01 : f32
    %34 = vector.broadcast %cst_20 : f32 to vector<1x32xf32>
    %35 = arith.divf %33, %34 : vector<1x32xf32>
    %36 = vector.broadcast %35 : vector<1x32xf32> to vector<32x32xf32>
    %37 = arith.subf %31, %36 : vector<32x32xf32>
    %38 = arith.mulf %37, %37 : vector<32x32xf32>
    %cst_21 = arith.constant dense<0.000000e+00> : vector<32xf32>
    %39 = vector.multi_reduction <add>, %38, %cst_21 [0] : vector<32x32xf32> to vector<32xf32>
    %40 = vector.shape_cast %39 : vector<32xf32> to vector<1x32xf32>
    %cst_22 = arith.constant 3.200000e+01 : f32
    %41 = vector.broadcast %cst_22 : f32 to vector<1x32xf32>
    %42 = arith.divf %40, %41 : vector<1x32xf32>
    %43 = vector.broadcast %35 : vector<1x32xf32> to vector<32x32xf32>
    %44 = arith.subf %31, %43 : vector<32x32xf32>
    %cst_23 = arith.constant 9.99999974E-6 : f32
    %45 = vector.broadcast %cst_23 : f32 to vector<1x32xf32>
    %46 = arith.addf %42, %45 : vector<1x32xf32>
    %47 = math.rsqrt %46 : vector<1x32xf32>
    %48 = vector.broadcast %47 : vector<1x32xf32> to vector<32x32xf32>
    %49 = arith.mulf %44, %48 : vector<32x32xf32>
    %50 = vector.extract_strided_slice %0 {offsets = [2, 0], sizes = [1, 32], strides = [1, 1]} : vector<5x32xf32> to vector<1x32xf32>
    %51 = vector.broadcast %50 : vector<1x32xf32> to vector<32x32xf32>
    %52 = arith.mulf %49, %51 : vector<32x32xf32>
    %53 = vector.extract_strided_slice %0 {offsets = [3, 0], sizes = [1, 32], strides = [1, 1]} : vector<5x32xf32> to vector<1x32xf32>
    %54 = vector.broadcast %53 : vector<1x32xf32> to vector<32x32xf32>
    %55 = arith.addf %52, %54 : vector<32x32xf32>
    %c0_24 = arith.constant 0 : index
    %c0_25 = arith.constant 0 : index
    %56 = vector.load %arg6[%c0_24, %c0_25] : memref<32x32xf32, #tpu.memory_space<vmem>>, vector<32x32xf32>
    tpu.vector_store %arg6[%c0_24, %c0_25], %55 {strides = array<i32>} : memref<32x32xf32, #tpu.memory_space<vmem>>, vector<32x32xf32>,
    %57 = vector.extract_strided_slice %0 {offsets = [4, 0], sizes = [1, 32], strides = [1, 1]} : vector<5x32xf32> to vector<1x32xf32>
    %58 = vector.broadcast %57 : vector<1x32xf32> to vector<32x32xf32>
    %59 = arith.mulf %55, %58 : vector<32x32xf32>
    %cst_26 = arith.constant dense<0.000000e+00> : vector<32xf32>
    %60 = vector.multi_reduction <add>, %59, %cst_26 [1] : vector<32x32xf32> to vector<32xf32>
    %61 = vector.shape_cast %60 : vector<32xf32> to vector<32x1xf32>
    %62 = arith.mulf %57, %57 : vector<1x32xf32>
    %63 = vector.shape_cast %62 : vector<1x32xf32> to vector<1x1x32xf32>
    %cst_27 = arith.constant dense<0.000000e+00> : vector<1xf32>
    %64 = vector.multi_reduction <add>, %63, %cst_27 [1, 2] : vector<1x1x32xf32> to vector<1xf32>
    %65 = vector.shape_cast %64 : vector<1xf32> to vector<1x1x1xf32>
    %66 = vector.extract %65[0, 0, 0] : f32 from vector<1x1x1xf32>
    %67 = math.sqrt %66 : f32
    %68 = vector.broadcast %67 : f32 to vector<32x1xf32>
    %69 = arith.divf %61, %68 : vector<32x1xf32>
    %70 = math.tanh %69 : vector<32x1xf32>
    %c0_28 = arith.constant 0 : index
    %c0_29 = arith.constant 0 : index
    %71 = vector.load %arg7[%c0_28, %c0_29] : memref<32x1xf32, #tpu.memory_space<vmem>>, vector<32x1xf32>
    tpu.vector_store %arg7[%c0_28, %c0_29], %70 {strides = array<i32>} : memref<32x1xf32, #tpu.memory_space<vmem>>, vector<32x1xf32>,
    return
  }
}

module attributes {stable_mosaic.version = 11 : i64} {
  func.func @tail_kernel(%arg0: memref<2x16x32xf32, #tpu.memory_space<vmem>>, %arg1: memref<2x8x32xf32, #tpu.memory_space<vmem>>, %arg2: memref<64x32xf32, #tpu.memory_space<vmem>>, %arg3: memref<1x32xf32, #tpu.memory_space<vmem>>, %arg4: memref<2x32xf32, #tpu.memory_space<vmem>>) attributes {dimension_semantics = [], scalar_prefetch = 0 : i64, scratch_operands = 0 : i64, tpu.core_type = #tpu.core_type<tc>} {
    %c0 = arith.constant 0 : index
    %c0_0 = arith.constant 0 : index
    %c0_1 = arith.constant 0 : index
    %0 = vector.load %arg0[%c0, %c0_0, %c0_1] : memref<2x16x32xf32, #tpu.memory_space<vmem>>, vector<2x16x32xf32>
    %c0_2 = arith.constant 0 : index
    %c0_3 = arith.constant 0 : index
    %c0_4 = arith.constant 0 : index
    %1 = vector.load %arg1[%c0_2, %c0_3, %c0_4] : memref<2x8x32xf32, #tpu.memory_space<vmem>>, vector<2x8x32xf32>
    %cst = arith.constant dense<0xFF800000> : vector<2x32xf32>
    %2 = vector.multi_reduction <maximumf>, %0, %cst [1] : vector<2x16x32xf32> to vector<2x32xf32>
    %cst_5 = arith.constant dense<0xFF800000> : vector<2x32xf32>
    %3 = vector.multi_reduction <maximumf>, %1, %cst_5 [1] : vector<2x8x32xf32> to vector<2x32xf32>
    %4 = arith.addf %2, %3 : vector<2x32xf32>
    %cst_6 = arith.constant dense<0.000000e+00> : vector<2x32xf32>
    %5 = vector.multi_reduction <add>, %0, %cst_6 [1] : vector<2x16x32xf32> to vector<2x32xf32>
    %cst_7 = arith.constant 1.600000e+01 : f32
    %6 = vector.broadcast %cst_7 : f32 to vector<2x32xf32>
    %7 = arith.divf %5, %6 : vector<2x32xf32>
    %cst_8 = arith.constant dense<0.000000e+00> : vector<2x32xf32>
    %8 = vector.multi_reduction <add>, %1, %cst_8 [1] : vector<2x8x32xf32> to vector<2x32xf32>
    %cst_9 = arith.constant 8.000000e+00 : f32
    %9 = vector.broadcast %cst_9 : f32 to vector<2x32xf32>
    %10 = arith.divf %8, %9 : vector<2x32xf32>
    %11 = arith.addf %7, %10 : vector<2x32xf32>
    %c0_10 = arith.constant 0 : index
    %c0_11 = arith.constant 0 : index
    %12 = vector.load %arg2[%c0_10, %c0_11] : memref<64x32xf32, #tpu.memory_space<vmem>>, vector<32x32xf32>
    %cst_12 = arith.constant dense<0.000000e+00> : vector<2x32xf32>
    %13 = tpu.matmul %4, %12, %cst_12 {dimension_numbers = #tpu.dot_dimension_numbers<[1], [0], [0], [1], [0, 0, 1, 1], [], []>} : vector<2x32xf32>, vector<32x32xf32>, vector<2x32xf32> -> vector<2x32xf32>
    %c32 = arith.constant 32 : index
    %c0_13 = arith.constant 0 : index
    %14 = vector.load %arg2[%c32, %c0_13] : memref<64x32xf32, #tpu.memory_space<vmem>>, vector<32x32xf32>
    %cst_14 = arith.constant dense<0.000000e+00> : vector<2x32xf32>
    %15 = tpu.matmul %11, %14, %cst_14 {dimension_numbers = #tpu.dot_dimension_numbers<[1], [0], [0], [1], [0, 0, 1, 1], [], []>} : vector<2x32xf32>, vector<32x32xf32>, vector<2x32xf32> -> vector<2x32xf32>
    %16 = arith.addf %13, %15 : vector<2x32xf32>
    %c0_15 = arith.constant 0 : index
    %c0_16 = arith.constant 0 : index
    %17 = vector.load %arg3[%c0_15, %c0_16] : memref<1x32xf32, #tpu.memory_space<vmem>>, vector<1x32xf32>
    %18 = vector.broadcast %17 : vector<1x32xf32> to vector<2x32xf32>
    %19 = arith.addf %16, %18 : vector<2x32xf32>
    %c0_17 = arith.constant 0 : index
    %c0_18 = arith.constant 0 : index
    %20 = vector.load %arg4[%c0_17, %c0_18] : memref<2x32xf32, #tpu.memory_space<vmem>>, vector<2x32xf32>
    tpu.vector_store %arg4[%c0_17, %c0_18], %19 {strides = array<i32>} : memref<2x32xf32, #tpu.memory_space<vmem>>, vector<2x32xf32>,
    return
  }
}

</mosaic_0001>

<bundles_post_ra>
// kernel: squeeze.2
= control target key start
LH: loop header
LB: loop body
LE: loop exit
PB: predicated region body
PF: predicated region fallthrough
CT: control target
= control target key end

     0   :  { %vm8_vm0 = vcmask 261120   ;;  %s42_s0 = inlined_call_operand.vmem [shape: f32[64], index: 0, kind: input, shape index: {}]   ;;  %s43_s1 = inlined_call_operand.vmem [shape: f32[2,32], index: 1, kind: output, shape index: {}]  }
   0x1   :  { %v5_v0 = vld [vmem:[%s42_s0] sm:$0x1]  ;;  %s25_s0 = smov 96  }
   0x2   :  { %6 = vst [vmem:[#allocation1] sm:$0x1] %v5_v0 }
   0x9   :  { %v10_v1 = vld [vmem:[#allocation1] sm:$0x1]  }
   0xa   :  { %v7_v2 = vld [vmem:[#allocation1] sm:$0x1]   ;;  %11 = vrot.lane.b32.xlu0 %v10_v1, %s25_s0 }
   0xb   :  { %9 = vst.msk [vmem:[#allocation0] sm:$0x1] %vm8_vm0, %v7_v2  }
  0x7c   :  { %v12_v3 = vpop.permute.xlu0 %11  }
  0x7d   :  { %15 = vst.msk [vmem:[#allocation0 + $0x1] sm:$0x1] %vm8_vm0, %v12_v3  }
  0x84   :  { %v20_v4 = vld [vmem:[#allocation0] sm:$0x3] }
  0x85   :  { %23 = vst [vmem:[%s43_s1] sm:$0x3] %v20_v4 }

// kernel: squeeze.3
= control target key start
LH: loop header
LB: loop body
LE: loop exit
PB: predicated region body
PF: predicated region fallthrough
CT: control target
= control target key end

     0   :  { %vm8_vm0 = vcmask 130048   ;;  %s42_s0 = inlined_call_operand.vmem [shape: f32[32], index: 0, kind: input, shape index: {}]   ;;  %s43_s1 = inlined_call_operand.vmem [shape: f32[2,16], index: 1, kind: output, shape index: {}]  }
   0x1   :  { %v5_v0 = vld [vmem:[%s42_s0] sm:$0x1]  ;;  %s25_s0 = smov 112  }
   0x2   :  { %6 = vst [vmem:[#allocation1] sm:$0x1] %v5_v0 }
   0x9   :  { %v10_v1 = vld [vmem:[#allocation1] sm:$0x1]  }
   0xa   :  { %v7_v2 = vld [vmem:[#allocation1] sm:$0x1]   ;;  %11 = vrot.lane.b32.xlu0 %v10_v1, %s25_s0 }
   0xb   :  { %9 = vst.msk [vmem:[#allocation0] sm:$0x1] %vm8_vm0, %v7_v2  }
  0x7c   :  { %v12_v3 = vpop.permute.xlu0 %11  }
  0x7d   :  { %15 = vst.msk [vmem:[#allocation0 + $0x1] sm:$0x1] %vm8_vm0, %v12_v3  }
  0x84   :  { %v20_v4 = vld [vmem:[#allocation0] sm:$0x3] }
  0x85   :  { %23 = vst [vmem:[%s43_s1] sm:$0x3] %v20_v4 }

// kernel: forward.3
= control target key start
LH: loop header
LB: loop body
LE: loop exit
PB: predicated region body
PF: predicated region fallthrough
CT: control target
= control target key end

     0   :  { %13 = vsyncpa [#allocation3], 0  ;;  %s1248_s0 = inlined_call_operand.vmem [shape: f32[64,64], index: 0, kind: input, shape index: {}]   ;;  %s1249_s1 = inlined_call_operand.vmem [shape: f32[64,16], index: 1, kind: input, shape index: {}, may-alias: {1,2}]   ;;  %s1250_s2 = inlined_call_operand.vmem [shape: f32[64,16], index: 2, kind: input, shape index: {}, may-alias: {1,2}]   ;;  %s1251_s3 = inlined_call_operand.vmem [shape: f32[16,32], index: 3, kind: input, shape index: {}]   ;;  %s1252_s4 = inlined_call_operand.hbm [shape: f32[32,32], index: 4, kind: input, shape index: {}]   ;;  %s1253_s5 = inlined_call_operand.hbm [shape: f32[5,32], index: 5, kind: input, shape index: {}]   ;;  %s1254_s6 = inlined_call_operand.vmem [shape: f32[64,32], index: 6, kind: output, shape index: {0}]   ;;  %s1255_s7 = inlined_call_operand.vmem [shape: f32[64,1], index: 7, kind: output, shape index: {1}]  }
   0x1   :  { %14 = vsyncpa [#allocation5], 0  ;;  %s992_s24 = smov [#allocation2]  }
   0x2   :  { %s28_s25 = sshll.u32 %s992_s24, 4  ;;  %s29_s25 = int_to_ptr.vmem [resolvable:$true] %s28_s25 }
   0x3   :  { %s956_s26 = scalar_lea.vmem %s29_s25, 512  ;;  %p961_p1 = scmp.lt.s32.totalorder %s29_s25, %s29_s25 }
   0x4   :  { %p957_p0 = scmp.ne.s32.totalorder %s29_s25, %s956_s26  ;;  %p962_p2 = scmp.lt.s32.totalorder %s956_s26, %s956_s26 }
   0x6   :  { %p963_p3 = por %p962_p2, %p961_p1 }
   0x8   :  { %p964_p4 = pnand %p963_p3, %p957_p0 }
   0xa   :  { %967 = shalt.err (!%p964_p4)
}
   0xb   :  { %s993_s27 = smov 128   ;;  %s994_s28 = smov 8  }
   0xc   :  { %34 = dma.hbm_to_vmem [thread:$0]  %s1252_s4, 512, %s29_s25, [#allocation3], %s993_s27, %s993_s27, %s994_s28  }
   0xd   :  { %s995_s8 = smov [#allocation4]  }
   0xe   :  { %s41_s9 = sshll.u32 %s995_s8, 4  ;;  %s42_s9 = int_to_ptr.vmem [resolvable:$true] %s41_s9 }
   0xf   :  { %s976_s10 = scalar_lea.vmem %s42_s9, 128  ;;  %p981_p6 = scmp.lt.s32.totalorder %s42_s9, %s42_s9 }
  0x10   :  { %p977_p5 = scmp.ne.s32.totalorder %s42_s9, %s976_s10  ;;  %p982_p7 = scmp.lt.s32.totalorder %s976_s10, %s976_s10 }
  0x12   :  { %p983_p8 = por %p982_p7, %p981_p6 }
  0x14   :  { %p984_p9 = pnand %p983_p8, %p977_p5 }
  0x16   :  { %987 = shalt.err (!%p984_p9)
}
  0x17   :  { %44 = dma.hbm_to_vmem [thread:$0]  %s1253_s5, 128, %s42_s9, [#allocation5]  }
  0x18   :  { %988 = dma.done.wait [#allocation3], 512  }
  0x19   :  { %989 = vsyncadd [#allocation3], 4294966784 }
  0x1a   :  { %990 = dma.done.wait [#allocation5], 128  }
  0x1b   :  { %991 = vsyncadd [#allocation5], 4294967168  ;;  %v67_v0 = vld [vmem:[%s1249_s1 + $0x38] sm:$0xff]  ;;  %v66_v1 = vld [vmem:[%s1249_s1 + $0x30] sm:$0xff]  ;;  %vm76_vm0 = vcmask 523264   ;;  %vm212_vm1 = vcmask 130048   ;;  %v208_v50 = vlaneseq }
  0x1c   :  { %822 = vmatprep.subr.mxu0 %v67_v0  ;;  %v65_v2 = vld [vmem:[%s1249_s1 + $0x28] sm:$0xff]  ;;  %v52_v3 = vld [vmem:[%s1248_s0] sm:$0xff]  ;;  %v63_v5 = vld [vmem:[%s1249_s1 + $0x18] sm:$0xff]  ;;  %vm703_vm2 = vcmask 253952   ;;  %vm390_vm3 = vcmask 261120   ;;  %vm741_vm6 = vcmask 7168  }
  0x1d   :  { %823 = vmatpush3.msra.mxu0 %v67_v0  ;;  %838 = vmatprep.mubr.msk.f32.mxu0 %vm76_vm0, %v52_v3  ;;  %v64_v4 = vld [vmem:[%s1249_s1 + $0x20] sm:$0xff]  ;;  %v62_v6 = vld [vmem:[%s1249_s1 + $0x10] sm:$0xff]  ;;  %v61_v7 = vld [vmem:[%s1249_s1 + $0x8] sm:$0xff]  ;;  %v1140_v51 = vshrl.u32 %v208_v50, 7 }
  0x1e   :  { %824 = vmatprep.subr.mxu0 %v66_v1  ;;  %v60_v8 = vld [vmem:[%s1249_s1] sm:$0xff]  ;;  %v53_v9 = vld [vmem:[%s1248_s0 + $0x8] sm:$0xff]  ;;  %v54_v10 = vld [vmem:[%s1248_s0 + $0x10] sm:$0xff] }
  0x1f   :  { %825 = vmatpush3.msra.mxu0 %v66_v1  ;;  %v55_v11 = vld [vmem:[%s1248_s0 + $0x18] sm:$0xff]  ;;  %v56_v12 = vld [vmem:[%s1248_s0 + $0x20] sm:$0xff]  ;;  %v57_v13 = vld [vmem:[%s1248_s0 + $0x28] sm:$0xff]  ;;  %v210_v52 = vsub.s32 0, %v1140_v51 }
  0x20   :  { %826 = vmatprep.subr.mxu0 %v65_v2  ;;  %v58_v14 = vld [vmem:[%s1248_s0 + $0x30] sm:$0xff]  ;;  %v59_v15 = vld [vmem:[%s1248_s0 + $0x38] sm:$0xff]  ;;  %v207_v16 = vld [vmem:[%s1251_s3 + $0x8] sm:$0xff] }
  0x21   :  { %827 = vmatpush3.msra.mxu0 %v65_v2  ;;  %850 = vmatprep.subr.mxu1 %v207_v16  ;;  %v206_v17 = vld [vmem:[%s1251_s3] sm:$0xff]  ;;  %v69_v20 = vld [vmem:[%s1250_s2 + $0x8] sm:$0xff]  ;;  %v70_v25 = vld [vmem:[%s1250_s2 + $0x10] sm:$0xff] }
  0x22   :  { %828 = vmatprep.subr.mxu0 %v64_v4  ;;  %851 = vmatpush3.msra.mxu1 %v207_v16  ;;  %v68_v19 = vld [vmem:[%s1250_s2] sm:$0xff]  ;;  %v71_v26 = vld [vmem:[%s1250_s2 + $0x18] sm:$0xff]  ;;  %v73_v32 = vld [vmem:[%s1250_s2 + $0x28] sm:$0xff] }
  0x23   :  { %829 = vmatpush3.msra.mxu0 %v64_v4  ;;  %852 = vmatprep.subr.mxu1 %v206_v17  ;;  %v72_v31 = vld [vmem:[%s1250_s2 + $0x20] sm:$0xff]  ;;  %v74_v37 = vld [vmem:[%s1250_s2 + $0x30] sm:$0xff]  ;;  %v75_v38 = vld [vmem:[%s1250_s2 + $0x38] sm:$0xff] }
  0x24   :  { %830 = vmatprep.subr.mxu0 %v63_v5  ;;  %853 = vmatpush3.msra.mxu1 %v206_v17  ;;  %v385_v42 = vld [vmem:[#allocation2 + $0x18] sm:$0xff]  ;;  %v384_v43 = vld [vmem:[#allocation2 + $0x10] sm:$0xff]  ;;  %v383_v44 = vld [vmem:[#allocation2 + $0x8] sm:$0xff] }
  0x25   :  { %831 = vmatpush3.msra.mxu0 %v63_v5  ;;  %866 = vmatprep.subr.mxu1 %v385_v42  ;;  %v382_v45 = vld [vmem:[#allocation2] sm:$0xff] }
  0x26   :  { %832 = vmatprep.subr.mxu0 %v62_v6  ;;  %v1136_v46 = vld [vmem:[#allocation4] sm:$0x1f] }
  0x27   :  { %833 = vmatpush3.msra.mxu0 %v62_v6  ;;  %v699_v47 = vmul.f32 %v1136_v46, %v1136_v46  ;;  %v211_v53 = vrot.slane %v1136_v46, %v210_v52 }
  0x28   :  { %834 = vmatprep.subr.mxu0 %v61_v7 }
  0x29   :  { %835 = vmatpush3.msra.mxu0 %v61_v7  ;;  %v701_v48 = vrot.slane %v699_v47, 4 }
  0x2a   :  { %836 = vmatprep.subr.mxu0 %v60_v8 }
  0x2b   :  { %837 = vmatpush3.msra.mxu0 %v60_v8  ;;  %v704_v49 = vsel %vm703_vm2, %v701_v48, 0.0 }
  0x2c   :  { %839 = vmatmul.mubr.msk.f32.vlgmr.msra.gmra.mxu0 %vm76_vm0, %v53_v9  ;;  %705 = vadd.xlane.f32.xlu0 %v704_v49 }
  0x2d   :  { %841 = vmatprep.mubr.msk.f32.mxu0 %vm76_vm0, %v54_v10 }
  0x30   :  { %842 = vmatmul.mubr.msk.f32.gmra.mxu0 %vm76_vm0, %v55_v11 }
  0x31   :  { %844 = vmatprep.mubr.msk.f32.mxu0 %vm76_vm0, %v56_v12 }
  0x34   :  { %845 = vmatmul.mubr.msk.f32.gmra.mxu0 %vm76_vm0, %v57_v13 }
  0x35   :  { %847 = vmatprep.mubr.msk.f32.mxu0 %vm76_vm0, %v58_v14 }
  0x38   :  { %848 = vmatmul.mubr.msk.f32.gmra.mxu0 %vm76_vm0, %v59_v15 }
  0xb5   :  { %v706_v47 = vpop.xlane.xlu0 %705 }
  0xb6   :  { %v707_v48 = vrot.slane %v706_v47, 4 }
  0xb8   :  { %v708_v49 = vadd.f32 %v707_v48, %v706_v47 }
  0xba   :  { %v709_v50 = vrot.slane %v708_v49, 2 }
  0xbc   :  { %v710_v52 = vadd.f32 %v709_v50, %v708_v49 }
  0xec   :  { %v840_v18 = vpop.f32.mrf.mxu0 }
  0xed   :  { %v173_v23 = vadd.f32 %v840_v18, %v69_v20 }
  0xee   :  { %v167_v21 = vpop.f32.mrf.mxu0 }
  0xef   :  { %v168_v22 = vadd.f32 %v167_v21, %v68_v19 }
  0xf0   :  { %v843_v24 = vpop.f32.mrf.mxu0 }
  0xf1   :  { %854 = vmatprep.mubr.msk.f32.mxu1 %vm212_vm1, %v168_v22  ;;  %v183_v29 = vadd.f32 %v843_v24, %v71_v26 }
  0xf2   :  { %v177_v27 = vpop.f32.mrf.mxu0  ;;  %855 = vmatmul.mubr.msk.f32.vlgmr.msra.gmra.mxu1 %vm212_vm1, %v173_v23 }
  0xf3   :  { %v178_v28 = vadd.f32 %v177_v27, %v70_v25  ;;  %867 = vmatpush3.msra.mxu1 %v385_v42 }
  0xf4   :  { %v846_v30 = vpop.f32.mrf.mxu0  ;;  %868 = vmatprep.subr.mxu1 %v384_v43 }
  0xf5   :  { %857 = vmatprep.mubr.msk.f32.mxu1 %vm212_vm1, %v178_v28  ;;  %v193_v35 = vadd.f32 %v846_v30, %v73_v32  ;;  %869 = vmatpush3.msra.mxu1 %v384_v43 }
  0xf6   :  { %v187_v33 = vpop.f32.mrf.mxu0  ;;  %858 = vmatmul.mubr.msk.f32.gmra.mxu1 %vm212_vm1, %v183_v29  ;;  %870 = vmatprep.subr.mxu1 %v383_v44 }
  0xf7   :  { %v188_v34 = vadd.f32 %v187_v33, %v72_v31  ;;  %871 = vmatpush3.msra.mxu1 %v383_v44 }
  0xf8   :  { %v849_v36 = vpop.f32.mrf.mxu0  ;;  %872 = vmatprep.subr.mxu1 %v382_v45 }
  0xf9   :  { %860 = vmatprep.mubr.msk.f32.mxu1 %vm212_vm1, %v188_v34  ;;  %v203_v41 = vadd.f32 %v849_v36, %v75_v38  ;;  %873 = vmatpush3.msra.mxu1 %v382_v45 }
  0xfa   :  { %v197_v39 = vpop.f32.mrf.mxu0  ;;  %861 = vmatmul.mubr.msk.f32.gmra.mxu1 %vm212_vm1, %v193_v35 }
  0xfb   :  { %v198_v40 = vadd.f32 %v197_v39, %v74_v37 }
  0xfd   :  { %863 = vmatprep.mubr.msk.f32.mxu1 %vm212_vm1, %v198_v40 }
  0xfe   :  { %864 = vmatmul.mubr.msk.f32.gmra.mxu1 %vm212_vm1, %v203_v41 }
 0x1b2   :  { %v856_v54 = vpop.f32.mrf.mxu1 }
 0x1b3   :  { %v309_v55 = vadd.f32 %v856_v54, %v211_v53 }
 0x1b4   :  { %v303_v56 = vpop.f32.mrf.mxu1 }
 0x1b5   :  { %v351_v57 = vmul.f32 0.70710677, %v309_v55  ;;  %v304_v58 = vadd.f32 %v303_v56, %v211_v53  ;;  %v343_v20 = vmul.f32 0.5, %v309_v55  ;;  %v388_v55 = vsub.s32 1, %v1140_v51 }
 0x1b6   :  { %v859_v59 = vpop.f32.mrf.mxu1 }
 0x1b7   :  { %894 = verf.f32 %v351_v57  ;;  %v350_v60 = vmul.f32 0.70710677, %v304_v58  ;;  %v319_v61 = vadd.f32 %v859_v59, %v211_v53  ;;  %v342_v17 = vmul.f32 0.5, %v304_v58 }
 0x1b8   :  { %v313_v62 = vpop.f32.mrf.mxu1  ;;  %v389_v56 = vrot.slane %v1136_v46, %v388_v55 }
 0x1b9   :  { %896 = verf.f32 %v350_v60  ;;  %v353_v63 = vmul.f32 0.70710677, %v319_v61  ;;  %v314_v0 = vadd.f32 %v313_v62, %v211_v53  ;;  %v345_v28 = vmul.f32 0.5, %v319_v61 }
 0x1ba   :  { %v862_v1 = vpop.f32.mrf.mxu1 }
 0x1bb   :  { %898 = verf.f32 %v353_v63  ;;  %v352_v2 = vmul.f32 0.70710677, %v314_v0  ;;  %v329_v3 = vadd.f32 %v862_v1, %v211_v53  ;;  %v344_v25 = vmul.f32 0.5, %v314_v0 }
 0x1bc   :  { %v323_v4 = vpop.f32.mrf.mxu1 }
 0x1bd   :  { %900 = verf.f32 %v352_v2  ;;  %v355_v5 = vmul.f32 0.70710677, %v329_v3  ;;  %v324_v6 = vadd.f32 %v323_v4, %v211_v53  ;;  %v347_v36 = vmul.f32 0.5, %v329_v3 }
 0x1be   :  { %v865_v7 = vpop.f32.mrf.mxu1 }
 0x1bf   :  { %902 = verf.f32 %v355_v5  ;;  %v354_v8 = vmul.f32 0.70710677, %v324_v6  ;;  %v339_v9 = vadd.f32 %v865_v7, %v211_v53  ;;  %v346_v33 = vmul.f32 0.5, %v324_v6 }
 0x1c0   :  { %v333_v10 = vpop.f32.mrf.mxu1 }
 0x1c1   :  { %904 = verf.f32 %v354_v8  ;;  %v357_v11 = vmul.f32 0.70710677, %v339_v9  ;;  %v334_v12 = vadd.f32 %v333_v10, %v211_v53  ;;  %v349_v43 = vmul.f32 0.5, %v339_v9 }
 0x1c2   :  { %v711_v53 = vrot.slane %v710_v52, 1 }
 0x1c3   :  { %906 = verf.f32 %v357_v11  ;;  %v356_v13 = vmul.f32 0.70710677, %v334_v12  ;;  %v348_v41 = vmul.f32 0.5, %v334_v12 }
 0x1c4   :  { %v895_v14 = vpop.eup %894  ;;  %v712_v54 = vadd.f32 %v711_v53, %v710_v52 }
 0x1c5   :  { %908 = verf.f32 %v356_v13  ;;  %v367_v16 = vadd.f32 1.0, %v895_v14 }
 0x1c6   :  { %v897_v15 = vpop.eup %896  ;;  %886 = vpush %v712_v54 }
 0x1c7   :  { %v366_v18 = vadd.f32 1.0, %v897_v15  ;;  %v375_v23 = vmul.f32 %v367_v16, %v343_v20 }
 0x1c8   :  { %v899_v19 = vpop.eup %898 }
 0x1c9   :  { %v374_v21 = vmul.f32 %v366_v18, %v342_v17  ;;  %v369_v24 = vadd.f32 1.0, %v899_v19 }
 0x1ca   :  { %v901_v22 = vpop.eup %900 }
 0x1cb   :  { %v368_v26 = vadd.f32 1.0, %v901_v22  ;;  %874 = vmatprep.mubr.msk.f32.mxu1 %vm390_vm3, %v374_v21  ;;  %v377_v31 = vmul.f32 %v369_v24, %v345_v28 }
 0x1cc   :  { %v903_v27 = vpop.eup %902  ;;  %875 = vmatmul.mubr.msk.f32.vlgmr.msra.gmra.mxu1 %vm390_vm3, %v375_v23 }
 0x1cd   :  { %v376_v29 = vmul.f32 %v368_v26, %v344_v25  ;;  %v371_v32 = vadd.f32 1.0, %v903_v27 }
 0x1ce   :  { %v905_v30 = vpop.eup %904 }
 0x1cf   :  { %v370_v34 = vadd.f32 1.0, %v905_v30  ;;  %877 = vmatprep.mubr.msk.f32.mxu1 %vm390_vm3, %v376_v29  ;;  %v379_v39 = vmul.f32 %v371_v32, %v347_v36 }
 0x1d0   :  { %v907_v35 = vpop.eup %906  ;;  %878 = vmatmul.mubr.msk.f32.gmra.mxu1 %vm390_vm3, %v377_v31 }
 0x1d1   :  { %v378_v37 = vmul.f32 %v370_v34, %v346_v33  ;;  %v373_v40 = vadd.f32 1.0, %v907_v35 }
 0x1d2   :  { %v909_v38 = vpop.eup %908 }
 0x1d3   :  { %v372_v42 = vadd.f32 1.0, %v909_v38  ;;  %880 = vmatprep.mubr.msk.f32.mxu1 %vm390_vm3, %v378_v37  ;;  %v381_v45 = vmul.f32 %v373_v40, %v349_v43 }
 0x1d4   :  { %881 = vmatmul.mubr.msk.f32.gmra.mxu1 %vm390_vm3, %v379_v39 }
 0x1d5   :  { %v380_v44 = vmul.f32 %v372_v42, %v348_v41 }
 0x1d7   :  { %883 = vmatprep.mubr.msk.f32.mxu1 %vm390_vm3, %v380_v44 }
 0x1d8   :  { %884 = vmatmul.mubr.msk.f32.gmra.mxu1 %vm390_vm3, %v381_v45 }
 0x1f7   :  { %s887_s2 = spop %886 }
 0x1f8   :  { %v714_v57 = vstv %s887_s2 }
 0x1f9   :  { %910 = vrsqrt.f32 %v714_v57  ;;  %vm717_vm4 = vcmp.eq.f32.partialorder %v714_v57, inf  ;;  %v720_v15 = vand.u32 2147483648, %v714_v57  ;;  %vm719_vm5 = vcmp.eq.f32.partialorder %v714_v57, 0.0 }
 0x206   :  { %v911_v12 = vpop.eup %910 }
 0x207   :  { %v716_v17 = vmul.f32 %v911_v12, %v714_v57 }
 0x209   :  { %v718_v20 = vsel %vm717_vm4, %v714_v57, %v716_v17 }
 0x20a   :  { %v721_v22 = vsel %vm719_vm5, %v720_v15, %v718_v20 }
 0x20b   :  { %888 = vpush %v721_v22 }
 0x28c   :  { %v876_v58 = vpop.f32.mrf.mxu1 }
 0x28d   :  { %v487_v59 = vadd.f32 %v876_v58, %v389_v56 }
 0x28e   :  { %v481_v60 = vpop.f32.mrf.mxu1 }
 0x28f   :  { %v529_v61 = vmul.f32 0.70710677, %v487_v59  ;;  %v482_v62 = vadd.f32 %v481_v60, %v389_v56  ;;  %v521_v26 = vmul.f32 0.5, %v487_v59 }
 0x290   :  { %v879_v63 = vpop.f32.mrf.mxu1 }
 0x291   :  { %912 = verf.f32 %v529_v61  ;;  %v528_v0 = vmul.f32 0.70710677, %v482_v62  ;;  %v497_v1 = vadd.f32 %v879_v63, %v389_v56  ;;  %v520_v27 = vmul.f32 0.5, %v482_v62 }
 0x292   :  { %v491_v2 = vpop.f32.mrf.mxu1 }
 0x293   :  { %914 = verf.f32 %v528_v0  ;;  %v531_v3 = vmul.f32 0.70710677, %v497_v1  ;;  %v492_v4 = vadd.f32 %v491_v2, %v389_v56  ;;  %v523_v35 = vmul.f32 0.5, %v497_v1 }
 0x294   :  { %v882_v5 = vpop.f32.mrf.mxu1 }
 0x295   :  { %916 = verf.f32 %v531_v3  ;;  %v530_v6 = vmul.f32 0.70710677, %v492_v4  ;;  %v507_v7 = vadd.f32 %v882_v5, %v389_v56  ;;  %v522_v36 = vmul.f32 0.5, %v492_v4 }
 0x296   :  { %v501_v8 = vpop.f32.mrf.mxu1 }
 0x297   :  { %918 = verf.f32 %v530_v6  ;;  %v533_v9 = vmul.f32 0.70710677, %v507_v7  ;;  %v502_v10 = vadd.f32 %v501_v8, %v389_v56  ;;  %v525_v47 = vmul.f32 0.5, %v507_v7 }
 0x298   :  { %v885_v11 = vpop.f32.mrf.mxu1 }
 0x299   :  { %920 = verf.f32 %v533_v9  ;;  %v532_v13 = vmul.f32 0.70710677, %v502_v10  ;;  %v517_v14 = vadd.f32 %v885_v11, %v389_v56  ;;  %v524_v48 = vmul.f32 0.5, %v502_v10 }
 0x29a   :  { %v511_v16 = vpop.f32.mrf.mxu1 }
 0x29b   :  { %922 = verf.f32 %v532_v13  ;;  %v535_v18 = vmul.f32 0.70710677, %v517_v14  ;;  %v512_v19 = vadd.f32 %v511_v16, %v389_v56  ;;  %v527_v60 = vmul.f32 0.5, %v517_v14 }
 0x29d   :  { %924 = verf.f32 %v535_v18  ;;  %v534_v21 = vmul.f32 0.70710677, %v512_v19  ;;  %v526_v61 = vmul.f32 0.5, %v512_v19 }
 0x29e   :  { %v913_v23 = vpop.eup %912 }
 0x29f   :  { %v545_v24 = vadd.f32 1.0, %v913_v23  ;;  %926 = verf.f32 %v534_v21 }
 0x2a0   :  { %v915_v25 = vpop.eup %914 }
 0x2a1   :  { %v544_v28 = vadd.f32 1.0, %v915_v25  ;;  %v553_v30 = vmul.f32 %v545_v24, %v521_v26 }
 0x2a2   :  { %v917_v29 = vpop.eup %916 }
 0x2a3   :  { %v552_v31 = vmul.f32 %v544_v28, %v520_v27  ;;  %v547_v32 = vadd.f32 1.0, %v917_v29  ;;  %v561_v39 = vsel %vm390_vm3, %v553_v30, 0.0 }
 0x2a4   :  { %v919_v33 = vpop.eup %918 }
 0x2a5   :  { %v560_v34 = vsel %vm390_vm3, %v552_v31, 0.0  ;;  %v546_v37 = vadd.f32 1.0, %v919_v33  ;;  %v555_v40 = vmul.f32 %v547_v32, %v523_v35 }
 0x2a6   :  { %v921_v38 = vpop.eup %920  ;;  %v562_v44 = vadd.f32 %v561_v39, %v560_v34 }
 0x2a7   :  { %v554_v41 = vmul.f32 %v546_v37, %v522_v36  ;;  %v549_v42 = vadd.f32 1.0, %v921_v38  ;;  %v565_v53 = vsel %vm390_vm3, %v555_v40, 0.0 }
 0x2a8   :  { %v923_v43 = vpop.eup %922 }
 0x2a9   :  { %v563_v45 = vsel %vm390_vm3, %v554_v41, 0.0  ;;  %v548_v49 = vadd.f32 1.0, %v923_v43  ;;  %v557_v54 = vmul.f32 %v549_v42, %v525_v47 }
 0x2aa   :  { %v925_v50 = vpop.eup %924  ;;  %v564_v52 = vadd.f32 %v563_v45, %v562_v44 }
 0x2ab   :  { %v556_v55 = vmul.f32 %v548_v49, %v524_v48  ;;  %v551_v56 = vadd.f32 1.0, %v925_v50  ;;  %v569_v0 = vsel %vm390_vm3, %v557_v54, 0.0 }
 0x2ac   :  { %v927_v57 = vpop.eup %926  ;;  %v566_v58 = vadd.f32 %v565_v53, %v564_v52 }
 0x2ad   :  { %v567_v59 = vsel %vm390_vm3, %v556_v55, 0.0  ;;  %v550_v62 = vadd.f32 1.0, %v927_v57  ;;  %v559_v1 = vmul.f32 %v551_v56, %v527_v60  ;;  %v633_v56 = vsub.s32 2, %v1140_v51 }
 0x2ae   :  { %v568_v63 = vadd.f32 %v567_v59, %v566_v58  ;;  %v645_v57 = vsub.s32 3, %v1140_v51  ;;  %v665_v58 = vsub.s32 4, %v1140_v51 }
 0x2af   :  { %v558_v2 = vmul.f32 %v550_v62, %v526_v61  ;;  %v573_v6 = vsel %vm390_vm3, %v559_v1, 0.0  ;;  %v634_v59 = vrot.slane %v1136_v46, %v633_v56 }
 0x2b0   :  { %v570_v3 = vadd.f32 %v569_v0, %v568_v63  ;;  %v646_v61 = vrot.slane %v1136_v46, %v645_v57  ;;  %v666_v62 = vrot.slane %v1136_v46, %v665_v58 }
 0x2b1   :  { %v571_v4 = vsel %vm390_vm3, %v558_v2, 0.0 }
 0x2b2   :  { %v572_v5 = vadd.f32 %v571_v4, %v570_v3 }
 0x2b4   :  { %v574_v7 = vadd.f32 %v573_v6, %v572_v5 }
 0x2b6   :  { %v575_v8 = vrot.slane %v574_v7, 4 }
 0x2b8   :  { %v576_v9 = vadd.f32 %v575_v8, %v574_v7 }
 0x2ba   :  { %v577_v10 = vrot.slane %v576_v9, 2 }
 0x2bc   :  { %v578_v11 = vadd.f32 %v577_v10, %v576_v9 }
 0x2be   :  { %v579_v12 = vrot.slane %v578_v11, 1 }
 0x2c0   :  { %v580_v13 = vadd.f32 %v579_v12, %v578_v11 }
 0x2c2   :  { %v582_v14 = vmul.f32 0.015625, %v580_v13 }
 0x2c4   :  { %v583_v15 = vsub.f32 %v552_v31, %v582_v14  ;;  %v584_v16 = vsub.f32 %v553_v30, %v582_v14  ;;  %v585_v17 = vsub.f32 %v554_v41, %v582_v14  ;;  %v586_v18 = vsub.f32 %v555_v40, %v582_v14 }
 0x2c5   :  { %v587_v19 = vsub.f32 %v556_v55, %v582_v14  ;;  %v588_v23 = vsub.f32 %v557_v54, %v582_v14  ;;  %v589_v28 = vsub.f32 %v558_v2, %v582_v14  ;;  %v590_v31 = vsub.f32 %v559_v1, %v582_v14 }
 0x2c6   :  { %v591_v20 = vmul.f32 %v583_v15, %v583_v15  ;;  %v592_v21 = vmul.f32 %v584_v16, %v584_v16  ;;  %v593_v22 = vmul.f32 %v585_v17, %v585_v17  ;;  %v594_v24 = vmul.f32 %v586_v18, %v586_v18 }
 0x2c7   :  { %v595_v29 = vmul.f32 %v587_v19, %v587_v19  ;;  %v596_v30 = vmul.f32 %v588_v23, %v588_v23  ;;  %v597_v36 = vmul.f32 %v589_v28, %v589_v28  ;;  %v598_v39 = vmul.f32 %v590_v31, %v590_v31 }
 0x2c8   :  { %v599_v25 = vsel %vm390_vm3, %v591_v20, 0.0  ;;  %v600_v26 = vsel %vm390_vm3, %v592_v21, 0.0  ;;  %v602_v32 = vsel %vm390_vm3, %v593_v22, 0.0  ;;  %v604_v34 = vsel %vm390_vm3, %v594_v24, 0.0 }
 0x2c9   :  { %v601_v27 = vadd.f32 %v600_v26, %v599_v25  ;;  %v606_v37 = vsel %vm390_vm3, %v595_v29, 0.0  ;;  %v608_v40 = vsel %vm390_vm3, %v596_v30, 0.0  ;;  %v610_v42 = vsel %vm390_vm3, %v597_v36, 0.0 }
 0x2ca   :  { %v612_v44 = vsel %vm390_vm3, %v598_v39, 0.0 }
 0x2cb   :  { %v603_v33 = vadd.f32 %v602_v32, %v601_v27 }
 0x2cd   :  { %v605_v35 = vadd.f32 %v604_v34, %v603_v33 }
 0x2cf   :  { %v607_v38 = vadd.f32 %v606_v37, %v605_v35 }
 0x2d1   :  { %v609_v41 = vadd.f32 %v608_v40, %v607_v38 }
 0x2d3   :  { %v611_v43 = vadd.f32 %v610_v42, %v609_v41 }
 0x2d5   :  { %v613_v45 = vadd.f32 %v612_v44, %v611_v43 }
 0x2d7   :  { %v614_v47 = vrot.slane %v613_v45, 4 }
 0x2d9   :  { %v615_v48 = vadd.f32 %v614_v47, %v613_v45 }
 0x2db   :  { %v616_v49 = vrot.slane %v615_v48, 2 }
 0x2dd   :  { %v617_v50 = vadd.f32 %v616_v49, %v615_v48 }
 0x2df   :  { %v618_v52 = vrot.slane %v617_v50, 1 }
 0x2e1   :  { %v619_v53 = vadd.f32 %v618_v52, %v617_v50 }
 0x2e3   :  { %v620_v54 = vmul.f32 0.015625, %v619_v53 }
 0x2e5   :  { %v621_v55 = vadd.f32 1e-05, %v620_v54 }
 0x2e7   :  { %928 = vrsqrt.f32 %v621_v55 }
 0x2f4   :  { %v929_v60 = vpop.eup %928 }
 0x2f5   :  { %v624_v63 = vmul.f32 %v929_v60, %v584_v16  ;;  %v623_v0 = vmul.f32 %v929_v60, %v583_v15  ;;  %v625_v1 = vmul.f32 %v929_v60, %v585_v17  ;;  %v626_v2 = vmul.f32 %v929_v60, %v586_v18 }
 0x2f6   :  { %v627_v3 = vmul.f32 %v929_v60, %v587_v19  ;;  %v628_v4 = vmul.f32 %v929_v60, %v588_v23  ;;  %v629_v5 = vmul.f32 %v929_v60, %v589_v28  ;;  %v630_v6 = vmul.f32 %v929_v60, %v590_v31 }
 0x2f7   :  { %v636_v7 = vmul.f32 %v634_v59, %v624_v63  ;;  %v635_v8 = vmul.f32 %v634_v59, %v623_v0  ;;  %v637_v9 = vmul.f32 %v634_v59, %v625_v1  ;;  %v638_v10 = vmul.f32 %v634_v59, %v626_v2 }
 0x2f8   :  { %v639_v51 = vmul.f32 %v634_v59, %v627_v3  ;;  %v640_v11 = vmul.f32 %v634_v59, %v628_v4  ;;  %v641_v12 = vmul.f32 %v634_v59, %v629_v5  ;;  %v642_v13 = vmul.f32 %v634_v59, %v630_v6 }
 0x2f9   :  { %v648_v14 = vadd.f32 %v646_v61, %v636_v7  ;;  %v647_v20 = vadd.f32 %v646_v61, %v635_v8  ;;  %v649_v21 = vadd.f32 %v646_v61, %v637_v9  ;;  %v650_v46 = vadd.f32 %v646_v61, %v638_v10 }
 0x2fa   :  { %v651_v16 = vadd.f32 %v646_v61, %v639_v51  ;;  %v652_v15 = vadd.f32 %v646_v61, %v640_v11  ;;  %v653_v17 = vadd.f32 %v646_v61, %v641_v12  ;;  %v654_v18 = vadd.f32 %v646_v61, %v642_v13 }
 0x2fb   :  { %v668_v19 = vmul.f32 %v666_v62, %v648_v14  ;;  %656 = vst.msk [vmem:[%s1254_s6 + $0x8] sm:$0xff] %vm390_vm3, %v648_v14  ;;  %v667_v22 = vmul.f32 %v666_v62, %v647_v20  ;;  %655 = vst.msk [vmem:[%s1254_s6] sm:$0xff] %vm390_vm3, %v647_v20  ;;  %v669_v25 = vmul.f32 %v666_v62, %v649_v21 }
 0x2fc   :  { %657 = vst.msk [vmem:[%s1254_s6 + $0x10] sm:$0xff] %vm390_vm3, %v649_v21  ;;  %658 = vst.msk [vmem:[%s1254_s6 + $0x18] sm:$0xff] %vm390_vm3, %v650_v46  ;;  %v670_v26 = vmul.f32 %v666_v62, %v650_v46  ;;  %v671_v29 = vmul.f32 %v666_v62, %v651_v16  ;;  %v672_v32 = vmul.f32 %v666_v62, %v652_v15 }
 0x2fd   :  { %659 = vst.msk [vmem:[%s1254_s6 + $0x20] sm:$0xff] %vm390_vm3, %v651_v16  ;;  %660 = vst.msk [vmem:[%s1254_s6 + $0x28] sm:$0xff] %vm390_vm3, %v652_v15  ;;  %v678_v23 = vsel %vm390_vm3, %v668_v19, 0.0  ;;  %v675_v24 = vsel %vm390_vm3, %v667_v22, 0.0  ;;  %v681_v27 = vsel %vm390_vm3, %v669_v25, 0.0  ;;  %v673_v30 = vmul.f32 %v666_v62, %v653_v17 }
 0x2fe   :  { %661 = vst.msk [vmem:[%s1254_s6 + $0x30] sm:$0xff] %vm390_vm3, %v653_v17  ;;  %662 = vst.msk [vmem:[%s1254_s6 + $0x38] sm:$0xff] %vm390_vm3, %v654_v18  ;;  %679 = vadd.xlane.f32.xlu1 %v678_v23  ;;  %676 = vadd.xlane.f32.xlu0 %v675_v24  ;;  %v684_v28 = vsel %vm390_vm3, %v670_v26, 0.0  ;;  %v687_v33 = vsel %vm390_vm3, %v671_v29, 0.0  ;;  %v690_v31 = vsel %vm390_vm3, %v672_v32, 0.0  ;;  %v674_v34 = vmul.f32 %v666_v62, %v654_v18  ;;  %s889_s6 = spop %888 }
 0x2ff   :  { %v693_v35 = vsel %vm390_vm3, %v673_v30, 0.0  ;;  %v723_v37 = vstv %s889_s6 }
 0x300   :  { %v696_v36 = vsel %vm390_vm3, %v674_v34, 0.0  ;;  %930 = vrcp.f32 %v723_v37 }
 0x302   :  { %682 = vadd.xlane.f32.xlu1 %v681_v27  ;;  %685 = vadd.xlane.f32.xlu0 %v684_v28 }
 0x306   :  { %688 = vadd.xlane.f32.xlu1 %v687_v33  ;;  %691 = vadd.xlane.f32.xlu0 %v690_v31 }
 0x30a   :  { %694 = vadd.xlane.f32.xlu1 %v693_v35  ;;  %697 = vadd.xlane.f32.xlu0 %v696_v36 }
 0x30d   :  { %v931_v38 = vpop.eup %930 }
 0x387   :  { %v680_v39 = vpop.xlane.xlu1 %679  ;;  %v677_v40 = vpop.xlane.xlu0 %676 }
 0x388   :  { %v726_v41 = vmul.f32 %v931_v38, %v680_v39  ;;  %v725_v42 = vmul.f32 %v931_v38, %v677_v40 }
 0x38a   :  { %932 = vtanh.f32 %v726_v41 }
 0x38b   :  { %934 = vtanh.f32 %v725_v42  ;;  %v683_v43 = vpop.xlane.xlu1 %682  ;;  %v686_v44 = vpop.xlane.xlu0 %685 }
 0x38c   :  { %v727_v45 = vmul.f32 %v931_v38, %v683_v43  ;;  %v728_v47 = vmul.f32 %v931_v38, %v686_v44 }
 0x38e   :  { %936 = vtanh.f32 %v727_v45 }
 0x38f   :  { %938 = vtanh.f32 %v728_v47  ;;  %v689_v48 = vpop.xlane.xlu1 %688  ;;  %v692_v49 = vpop.xlane.xlu0 %691 }
 0x390   :  { %v729_v50 = vmul.f32 %v931_v38, %v689_v48  ;;  %v730_v52 = vmul.f32 %v931_v38, %v692_v49 }
 0x392   :  { %940 = vtanh.f32 %v729_v50 }
 0x393   :  { %942 = vtanh.f32 %v730_v52  ;;  %v695_v53 = vpop.xlane.xlu1 %694  ;;  %v698_v54 = vpop.xlane.xlu0 %697 }
 0x394   :  { %v731_v55 = vmul.f32 %v931_v38, %v695_v53  ;;  %v732_v56 = vmul.f32 %v931_v38, %v698_v54 }
 0x396   :  { %944 = vtanh.f32 %v731_v55 }
 0x397   :  { %v933_v57 = vpop.eup %932  ;;  %946 = vtanh.f32 %v732_v56 }
 0x398   :  { %v935_v58 = vpop.eup %934  ;;  %743 = vst.msk [vmem:[%s1255_s7 + $0x8] sm:$0xff] %vm741_vm6, %v933_v57 }
 0x399   :  { %742 = vst.msk [vmem:[%s1255_s7] sm:$0xff] %vm741_vm6, %v935_v58 }
 0x39b   :  { %v937_v59 = vpop.eup %936 }
 0x39c   :  { %v939_v60 = vpop.eup %938  ;;  %744 = vst.msk [vmem:[%s1255_s7 + $0x10] sm:$0xff] %vm741_vm6, %v937_v59 }
 0x39d   :  { %745 = vst.msk [vmem:[%s1255_s7 + $0x18] sm:$0xff] %vm741_vm6, %v939_v60 }
 0x39f   :  { %v941_v61 = vpop.eup %940 }
 0x3a0   :  { %v943_v62 = vpop.eup %942  ;;  %746 = vst.msk [vmem:[%s1255_s7 + $0x20] sm:$0xff] %vm741_vm6, %v941_v61 }
 0x3a1   :  { %747 = vst.msk [vmem:[%s1255_s7 + $0x28] sm:$0xff] %vm741_vm6, %v943_v62 }
 0x3a3   :  { %v945_v63 = vpop.eup %944 }
 0x3a4   :  { %v947_v0 = vpop.eup %946  ;;  %748 = vst.msk [vmem:[%s1255_s7 + $0x30] sm:$0xff] %vm741_vm6, %v945_v63 }
 0x3a5   :  { %749 = vst.msk [vmem:[%s1255_s7 + $0x38] sm:$0xff] %vm741_vm6, %v947_v0 }
 0x3a6   :  { %758 = vsyncpa [#allocation3], 1 }
 0x3a7   :  { %759 = vsyncpa [#allocation5], 1 }

// kernel: forward.4
= control target key start
LH: loop header
LB: loop body
LE: loop exit
PB: predicated region body
PF: predicated region fallthrough
CT: control target
= control target key end

     0   :  { %vm42_vm0 = vcmask 523264   ;;  %vm148_vm1 = vcmask 261120   ;;  %vm478_vm2 = vcmask 253952   ;;  %v144_v36 = vlaneseq  ;;  %s828_s1 = inlined_call_operand.vmem [shape: f32[64,32], index: 1, kind: input, shape index: {}]   ;;  %s829_s0 = inlined_call_operand.vmem [shape: f32[32,64], index: 0, kind: input, shape index: {}]   ;;  %s830_s3 = inlined_call_operand.vmem [shape: f32[32,32], index: 3, kind: input, shape index: {}]   ;;  %s831_s2 = inlined_call_operand.vmem [shape: f32[32,32], index: 2, kind: input, shape index: {}]   ;;  %s832_s4 = inlined_call_operand.vmem [shape: f32[32,32], index: 4, kind: input, shape index: {}]   ;;  %s833_s5 = inlined_call_operand.vmem [shape: f32[5,32], index: 5, kind: input, shape index: {}]   ;;  %s834_s6 = inlined_call_operand.vmem [shape: f32[32,32], index: 6, kind: output, shape index: {0}]   ;;  %s835_s7 = inlined_call_operand.vmem [shape: f32[32,1], index: 7, kind: output, shape index: {1}]  }
   0x1   :  { %v37_v0 = vld [vmem:[%s828_s1 + $0x38] sm:$0xff]  ;;  %v36_v1 = vld [vmem:[%s828_s1 + $0x30] sm:$0xff]  ;;  %v35_v2 = vld [vmem:[%s828_s1 + $0x28] sm:$0xff]  ;;  %vm508_vm5 = vcmask 7168  }
   0x2   :  { %561 = vmatprep.subr.mxu0 %v37_v0  ;;  %v26_v3 = vld [vmem:[%s829_s0] sm:$0xff]  ;;  %v143_v5 = vld [vmem:[%s830_s3 + $0x18] sm:$0xff]  ;;  %v32_v7 = vld [vmem:[%s828_s1 + $0x10] sm:$0xff]  ;;  %v772_v37 = vshrl.u32 %v144_v36, 7 }
   0x3   :  { %562 = vmatpush3.msra.mxu0 %v37_v0  ;;  %577 = vmatprep.mubr.msk.f32.mxu0 %vm42_vm0, %v26_v3  ;;  %v34_v4 = vld [vmem:[%s828_s1 + $0x20] sm:$0xff]  ;;  %v33_v6 = vld [vmem:[%s828_s1 + $0x18] sm:$0xff]  ;;  %v31_v8 = vld [vmem:[%s828_s1 + $0x8] sm:$0xff] }
   0x4   :  { %563 = vmatprep.subr.mxu0 %v36_v1  ;;  %583 = vmatprep.subr.mxu1 %v143_v5  ;;  %v30_v9 = vld [vmem:[%s828_s1] sm:$0xff]  ;;  %v27_v10 = vld [vmem:[%s829_s0 + $0x8] sm:$0xff]  ;;  %v28_v11 = vld [vmem:[%s829_s0 + $0x10] sm:$0xff]  ;;  %v146_v38 = vsub.s32 0, %v772_v37 }
   0x5   :  { %564 = vmatpush3.msra.mxu0 %v36_v1  ;;  %584 = vmatpush3.msra.mxu1 %v143_v5  ;;  %v29_v12 = vld [vmem:[%s829_s0 + $0x18] sm:$0xff]  ;;  %v142_v13 = vld [vmem:[%s830_s3 + $0x10] sm:$0xff]  ;;  %v141_v14 = vld [vmem:[%s830_s3 + $0x8] sm:$0xff] }
   0x6   :  { %565 = vmatprep.subr.mxu0 %v35_v2  ;;  %585 = vmatprep.subr.mxu1 %v142_v13  ;;  %v140_v15 = vld [vmem:[%s830_s3] sm:$0xff]  ;;  %v39_v18 = vld [vmem:[%s831_s2 + $0x8] sm:$0xff]  ;;  %v40_v23 = vld [vmem:[%s831_s2 + $0x10] sm:$0xff] }
   0x7   :  { %566 = vmatpush3.msra.mxu0 %v35_v2  ;;  %586 = vmatpush3.msra.mxu1 %v142_v13  ;;  %v38_v17 = vld [vmem:[%s831_s2] sm:$0xff]  ;;  %v41_v24 = vld [vmem:[%s831_s2 + $0x18] sm:$0xff]  ;;  %v268_v29 = vld [vmem:[%s832_s4 + $0x10] sm:$0xff] }
   0x8   :  { %567 = vmatprep.subr.mxu0 %v34_v4  ;;  %587 = vmatprep.subr.mxu1 %v141_v14  ;;  %v269_v28 = vld [vmem:[%s832_s4 + $0x18] sm:$0xff]  ;;  %v267_v30 = vld [vmem:[%s832_s4 + $0x8] sm:$0xff]  ;;  %v266_v31 = vld [vmem:[%s832_s4] sm:$0xff] }
   0x9   :  { %568 = vmatpush3.msra.mxu0 %v34_v4  ;;  %588 = vmatpush3.msra.mxu1 %v141_v14  ;;  %v768_v32 = vld [vmem:[%s833_s5] sm:$0x1f] }
   0xa   :  { %569 = vmatprep.subr.mxu0 %v33_v6  ;;  %589 = vmatprep.subr.mxu1 %v140_v15  ;;  %v474_v33 = vmul.f32 %v768_v32, %v768_v32  ;;  %v147_v39 = vrot.slane %v768_v32, %v146_v38 }
   0xb   :  { %570 = vmatpush3.msra.mxu0 %v33_v6  ;;  %590 = vmatpush3.msra.mxu1 %v140_v15 }
   0xc   :  { %571 = vmatprep.subr.mxu0 %v32_v7  ;;  %597 = vmatprep.subr.mxu1 %v269_v28  ;;  %v476_v34 = vrot.slane %v474_v33, 4 }
   0xd   :  { %572 = vmatpush3.msra.mxu0 %v32_v7 }
   0xe   :  { %573 = vmatprep.subr.mxu0 %v31_v8  ;;  %v479_v35 = vsel %vm478_vm2, %v476_v34, 0.0 }
   0xf   :  { %574 = vmatpush3.msra.mxu0 %v31_v8  ;;  %480 = vadd.xlane.f32.xlu0 %v479_v35 }
  0x10   :  { %575 = vmatprep.subr.mxu0 %v30_v9 }
  0x11   :  { %576 = vmatpush3.msra.mxu0 %v30_v9 }
  0x12   :  { %578 = vmatmul.mubr.msk.f32.vlgmr.msra.gmra.mxu0 %vm42_vm0, %v27_v10 }
  0x13   :  { %580 = vmatprep.mubr.msk.f32.mxu0 %vm42_vm0, %v28_v11 }
  0x16   :  { %581 = vmatmul.mubr.msk.f32.gmra.mxu0 %vm42_vm0, %v29_v12  ;;  %v272_v12 = vsub.s32 1, %v772_v37 }
  0x18   :  { %v273_v13 = vrot.slane %v768_v32, %v272_v12 }
  0x98   :  { %v481_v4 = vpop.xlane.xlu0 %480 }
  0x99   :  { %v482_v5 = vrot.slane %v481_v4, 4 }
  0x9b   :  { %v483_v6 = vadd.f32 %v482_v5, %v481_v4 }
  0x9d   :  { %v484_v7 = vrot.slane %v483_v6, 2 }
  0x9f   :  { %v485_v8 = vadd.f32 %v484_v7, %v483_v6 }
  0xa1   :  { %v486_v9 = vrot.slane %v485_v8, 1 }
  0xa3   :  { %v487_v10 = vadd.f32 %v486_v9, %v485_v8 }
  0xa5   :  { %611 = vpush %v487_v10 }
  0xd2   :  { %v579_v16 = vpop.f32.mrf.mxu0 }
  0xd3   :  { %v127_v21 = vadd.f32 %v579_v16, %v39_v18 }
  0xd4   :  { %v121_v19 = vpop.f32.mrf.mxu0 }
  0xd5   :  { %v122_v20 = vadd.f32 %v121_v19, %v38_v17 }
  0xd6   :  { %v582_v22 = vpop.f32.mrf.mxu0  ;;  %s612_s4 = spop %611 }
  0xd7   :  { %591 = vmatprep.mubr.msk.f32.mxu1 %vm148_vm1, %v122_v20  ;;  %v137_v27 = vadd.f32 %v582_v22, %v41_v24  ;;  %v489_v11 = vstv %s612_s4 }
  0xd8   :  { %v131_v25 = vpop.f32.mrf.mxu0  ;;  %592 = vmatmul.mubr.msk.f32.vlgmr.msra.gmra.mxu1 %vm148_vm1, %v127_v21  ;;  %vm492_vm3 = vcmp.eq.f32.partialorder %v489_v11, inf  ;;  %v495_v19 = vand.u32 2147483648, %v489_v11  ;;  %vm494_vm4 = vcmp.eq.f32.partialorder %v489_v11, 0.0 }
  0xd9   :  { %v132_v26 = vadd.f32 %v131_v25, %v40_v23  ;;  %598 = vmatpush3.msra.mxu1 %v269_v28 }
  0xda   :  { %599 = vmatprep.subr.mxu1 %v268_v29 }
  0xdb   :  { %594 = vmatprep.mubr.msk.f32.mxu1 %vm148_vm1, %v132_v26  ;;  %600 = vmatpush3.msra.mxu1 %v268_v29 }
  0xdc   :  { %595 = vmatmul.mubr.msk.f32.gmra.mxu1 %vm148_vm1, %v137_v27  ;;  %601 = vmatprep.subr.mxu1 %v267_v30 }
  0xdd   :  { %602 = vmatpush3.msra.mxu1 %v267_v30 }
  0xde   :  { %603 = vmatprep.subr.mxu1 %v266_v31 }
  0xdf   :  { %604 = vmatpush3.msra.mxu1 %v266_v31 }
 0x198   :  { %v593_v40 = vpop.f32.mrf.mxu1 }
 0x199   :  { %v233_v41 = vadd.f32 %v593_v40, %v147_v39 }
 0x19a   :  { %v227_v42 = vpop.f32.mrf.mxu1 }
 0x19b   :  { %v251_v43 = vmul.f32 0.70710677, %v233_v41  ;;  %v228_v44 = vadd.f32 %v227_v42, %v147_v39  ;;  %v247_v58 = vmul.f32 0.5, %v233_v41 }
 0x19c   :  { %v596_v45 = vpop.f32.mrf.mxu1 }
 0x19d   :  { %615 = verf.f32 %v251_v43  ;;  %v250_v46 = vmul.f32 0.70710677, %v228_v44  ;;  %v243_v47 = vadd.f32 %v596_v45, %v147_v39  ;;  %v246_v55 = vmul.f32 0.5, %v228_v44 }
 0x19e   :  { %v237_v48 = vpop.f32.mrf.mxu1 }
 0x19f   :  { %617 = verf.f32 %v250_v46  ;;  %v253_v49 = vmul.f32 0.70710677, %v243_v47  ;;  %v238_v50 = vadd.f32 %v237_v48, %v147_v39  ;;  %v249_v1 = vmul.f32 0.5, %v243_v47 }
 0x1a1   :  { %619 = verf.f32 %v253_v49  ;;  %v252_v51 = vmul.f32 0.70710677, %v238_v50  ;;  %v248_v63 = vmul.f32 0.5, %v238_v50 }
 0x1a3   :  { %621 = verf.f32 %v252_v51 }
 0x1a4   :  { %623 = vrsqrt.f32 %v489_v11 }
 0x1aa   :  { %v616_v52 = vpop.eup %615 }
 0x1ab   :  { %v259_v54 = vadd.f32 1.0, %v616_v52 }
 0x1ac   :  { %v618_v53 = vpop.eup %617 }
 0x1ad   :  { %v258_v56 = vadd.f32 1.0, %v618_v53  ;;  %v263_v61 = vmul.f32 %v259_v54, %v247_v58 }
 0x1ae   :  { %v620_v57 = vpop.eup %619 }
 0x1af   :  { %v262_v59 = vmul.f32 %v258_v56, %v246_v55  ;;  %v261_v62 = vadd.f32 1.0, %v620_v57 }
 0x1b0   :  { %v622_v60 = vpop.eup %621 }
 0x1b1   :  { %v260_v0 = vadd.f32 1.0, %v622_v60  ;;  %605 = vmatprep.mubr.msk.f32.mxu1 %vm148_vm1, %v262_v59  ;;  %v265_v3 = vmul.f32 %v261_v62, %v249_v1  ;;  %v624_v15 = vpop.eup %623 }
 0x1b2   :  { %606 = vmatmul.mubr.msk.f32.vlgmr.msra.gmra.mxu1 %vm148_vm1, %v263_v61  ;;  %v491_v18 = vmul.f32 %v624_v15, %v489_v11 }
 0x1b3   :  { %v264_v2 = vmul.f32 %v260_v0, %v248_v63 }
 0x1b4   :  { %v493_v23 = vsel %vm492_vm3, %v489_v11, %v491_v18 }
 0x1b5   :  { %608 = vmatprep.mubr.msk.f32.mxu1 %vm148_vm1, %v264_v2  ;;  %v496_v27 = vsel %vm494_vm4, %v495_v19, %v493_v23  ;;  %v444_v23 = vsub.s32 3, %v772_v37 }
 0x1b6   :  { %609 = vmatmul.mubr.msk.f32.gmra.mxu1 %vm148_vm1, %v265_v3  ;;  %613 = vpush %v496_v27 }
 0x1b7   :  { %v445_v27 = vrot.slane %v768_v32, %v444_v23 }
 0x1e7   :  { %s614_s30 = spop %613 }
 0x272   :  { %v607_v14 = vpop.f32.mrf.mxu1 }
 0x273   :  { %v358_v16 = vadd.f32 %v607_v14, %v273_v13 }
 0x274   :  { %v352_v17 = vpop.f32.mrf.mxu1 }
 0x275   :  { %v376_v20 = vmul.f32 0.70710677, %v358_v16  ;;  %v353_v21 = vadd.f32 %v352_v17, %v273_v13  ;;  %v372_v35 = vmul.f32 0.5, %v358_v16 }
 0x276   :  { %v610_v22 = vpop.f32.mrf.mxu1 }
 0x277   :  { %625 = verf.f32 %v376_v20  ;;  %v375_v24 = vmul.f32 0.70710677, %v353_v21  ;;  %v368_v25 = vadd.f32 %v610_v22, %v273_v13  ;;  %v371_v36 = vmul.f32 0.5, %v353_v21 }
 0x278   :  { %v362_v26 = vpop.f32.mrf.mxu1  ;;  %v436_v22 = vsub.s32 2, %v772_v37 }
 0x279   :  { %627 = verf.f32 %v375_v24  ;;  %v378_v28 = vmul.f32 0.70710677, %v368_v25  ;;  %v363_v29 = vadd.f32 %v362_v26, %v273_v13  ;;  %v374_v45 = vmul.f32 0.5, %v368_v25 }
 0x27a   :  { %v456_v24 = vsub.s32 4, %v772_v37  ;;  %v437_v25 = vrot.slane %v768_v32, %v436_v22 }
 0x27b   :  { %629 = verf.f32 %v378_v28  ;;  %v377_v30 = vmul.f32 0.70710677, %v363_v29  ;;  %v373_v46 = vmul.f32 0.5, %v363_v29 }
 0x27d   :  { %631 = verf.f32 %v377_v30 }
 0x284   :  { %v626_v31 = vpop.eup %625 }
 0x285   :  { %v384_v33 = vadd.f32 1.0, %v626_v31 }
 0x286   :  { %v628_v34 = vpop.eup %627 }
 0x287   :  { %v383_v38 = vadd.f32 1.0, %v628_v34  ;;  %v388_v40 = vmul.f32 %v384_v33, %v372_v35  ;;  %v457_v33 = vrot.slane %v768_v32, %v456_v24 }
 0x288   :  { %v630_v39 = vpop.eup %629 }
 0x289   :  { %v387_v41 = vmul.f32 %v383_v38, %v371_v36  ;;  %v386_v42 = vadd.f32 1.0, %v630_v39  ;;  %v392_v48 = vsel %vm148_vm1, %v388_v40, 0.0 }
 0x28a   :  { %v632_v43 = vpop.eup %631 }
 0x28b   :  { %v391_v44 = vsel %vm148_vm1, %v387_v41, 0.0  ;;  %v385_v47 = vadd.f32 1.0, %v632_v43  ;;  %v390_v49 = vmul.f32 %v386_v42, %v374_v45 }
 0x28c   :  { %v393_v51 = vadd.f32 %v392_v48, %v391_v44 }
 0x28d   :  { %v389_v50 = vmul.f32 %v385_v47, %v373_v46  ;;  %v396_v54 = vsel %vm148_vm1, %v390_v49, 0.0 }
 0x28f   :  { %v394_v52 = vsel %vm148_vm1, %v389_v50, 0.0 }
 0x290   :  { %v395_v53 = vadd.f32 %v394_v52, %v393_v51 }
 0x292   :  { %v397_v55 = vadd.f32 %v396_v54, %v395_v53 }
 0x294   :  { %v398_v56 = vrot.slane %v397_v55, 4 }
 0x296   :  { %v399_v57 = vadd.f32 %v398_v56, %v397_v55 }
 0x298   :  { %v400_v58 = vrot.slane %v399_v57, 2 }
 0x29a   :  { %v401_v59 = vadd.f32 %v400_v58, %v399_v57 }
 0x29c   :  { %v402_v60 = vrot.slane %v401_v59, 1 }
 0x29e   :  { %v403_v61 = vadd.f32 %v402_v60, %v401_v59 }
 0x2a0   :  { %v405_v62 = vmul.f32 0.03125, %v403_v61 }
 0x2a2   :  { %v408_v63 = vsub.f32 %v389_v50, %v405_v62  ;;  %v409_v0 = vsub.f32 %v390_v49, %v405_v62  ;;  %v406_v1 = vsub.f32 %v387_v41, %v405_v62  ;;  %v407_v2 = vsub.f32 %v388_v40, %v405_v62 }
 0x2a3   :  { %v498_v49 = vstv %s614_s30 }
 0x2a4   :  { %v412_v3 = vmul.f32 %v408_v63, %v408_v63  ;;  %v410_v4 = vmul.f32 %v406_v1, %v406_v1  ;;  %v411_v5 = vmul.f32 %v407_v2, %v407_v2  ;;  %v413_v6 = vmul.f32 %v409_v0, %v409_v0 }
 0x2a6   :  { %v414_v7 = vsel %vm148_vm1, %v410_v4, 0.0  ;;  %v415_v8 = vsel %vm148_vm1, %v411_v5, 0.0  ;;  %v417_v10 = vsel %vm148_vm1, %v412_v3, 0.0  ;;  %v419_v12 = vsel %vm148_vm1, %v413_v6, 0.0 }
 0x2a7   :  { %v416_v9 = vadd.f32 %v415_v8, %v414_v7 }
 0x2a9   :  { %v418_v11 = vadd.f32 %v417_v10, %v416_v9 }
 0x2ab   :  { %v420_v13 = vadd.f32 %v419_v12, %v418_v11 }
 0x2ad   :  { %v421_v14 = vrot.slane %v420_v13, 4 }
 0x2af   :  { %v422_v15 = vadd.f32 %v421_v14, %v420_v13 }
 0x2b1   :  { %v423_v16 = vrot.slane %v422_v15, 2 }
 0x2b3   :  { %v424_v17 = vadd.f32 %v423_v16, %v422_v15 }
 0x2b5   :  { %v425_v18 = vrot.slane %v424_v17, 1 }
 0x2b7   :  { %v426_v19 = vadd.f32 %v425_v18, %v424_v17 }
 0x2b9   :  { %v427_v20 = vmul.f32 0.03125, %v426_v19 }
 0x2bb   :  { %v428_v21 = vadd.f32 1e-05, %v427_v20 }
 0x2bd   :  { %633 = vrsqrt.f32 %v428_v21 }
 0x2be   :  { %635 = vrcp.f32 %v498_v49 }
 0x2ca   :  { %v634_v26 = vpop.eup %633 }
 0x2cb   :  { %v431_v28 = vmul.f32 %v634_v26, %v407_v2  ;;  %v430_v29 = vmul.f32 %v634_v26, %v406_v1  ;;  %v432_v30 = vmul.f32 %v634_v26, %v408_v63  ;;  %v433_v31 = vmul.f32 %v634_v26, %v409_v0  ;;  %v636_v50 = vpop.eup %635 }
 0x2cd   :  { %v439_v34 = vmul.f32 %v437_v25, %v431_v28  ;;  %v438_v35 = vmul.f32 %v437_v25, %v430_v29  ;;  %v440_v36 = vmul.f32 %v437_v25, %v432_v30  ;;  %v441_v38 = vmul.f32 %v437_v25, %v433_v31 }
 0x2cf   :  { %v447_v39 = vadd.f32 %v445_v27, %v439_v34  ;;  %v446_v40 = vadd.f32 %v445_v27, %v438_v35  ;;  %v448_v41 = vadd.f32 %v445_v27, %v440_v36  ;;  %v449_v42 = vadd.f32 %v445_v27, %v441_v38 }
 0x2d1   :  { %v459_v37 = vmul.f32 %v457_v33, %v447_v39  ;;  %451 = vst.msk [vmem:[%s834_s6 + $0x8] sm:$0xff] %vm148_vm1, %v447_v39  ;;  %v458_v43 = vmul.f32 %v457_v33, %v446_v40  ;;  %450 = vst.msk [vmem:[%s834_s6] sm:$0xff] %vm148_vm1, %v446_v40  ;;  %v460_v45 = vmul.f32 %v457_v33, %v448_v41 }
 0x2d2   :  { %452 = vst.msk [vmem:[%s834_s6 + $0x10] sm:$0xff] %vm148_vm1, %v448_v41  ;;  %453 = vst.msk [vmem:[%s834_s6 + $0x18] sm:$0xff] %vm148_vm1, %v449_v42  ;;  %v461_v46 = vmul.f32 %v457_v33, %v449_v42 }
 0x2d3   :  { %v465_v32 = vsel %vm148_vm1, %v459_v37, 0.0  ;;  %v462_v44 = vsel %vm148_vm1, %v458_v43, 0.0  ;;  %v468_v47 = vsel %vm148_vm1, %v460_v45, 0.0 }
 0x2d4   :  { %466 = vadd.xlane.f32.xlu1 %v465_v32  ;;  %463 = vadd.xlane.f32.xlu0 %v462_v44  ;;  %v471_v48 = vsel %vm148_vm1, %v461_v46, 0.0 }
 0x2d8   :  { %469 = vadd.xlane.f32.xlu1 %v468_v47  ;;  %472 = vadd.xlane.f32.xlu0 %v471_v48 }
 0x35d   :  { %v467_v51 = vpop.xlane.xlu1 %466  ;;  %v464_v52 = vpop.xlane.xlu0 %463 }
 0x35e   :  { %v501_v53 = vmul.f32 %v636_v50, %v467_v51  ;;  %v500_v54 = vmul.f32 %v636_v50, %v464_v52 }
 0x360   :  { %637 = vtanh.f32 %v501_v53 }
 0x361   :  { %639 = vtanh.f32 %v500_v54  ;;  %v470_v55 = vpop.xlane.xlu1 %469  ;;  %v473_v56 = vpop.xlane.xlu0 %472 }
 0x362   :  { %v502_v57 = vmul.f32 %v636_v50, %v470_v55  ;;  %v503_v58 = vmul.f32 %v636_v50, %v473_v56 }
 0x364   :  { %641 = vtanh.f32 %v502_v57 }
 0x365   :  { %643 = vtanh.f32 %v503_v58 }
 0x36d   :  { %v638_v59 = vpop.eup %637 }
 0x36e   :  { %v640_v60 = vpop.eup %639  ;;  %510 = vst.msk [vmem:[%s835_s7 + $0x8] sm:$0xff] %vm508_vm5, %v638_v59 }
 0x36f   :  { %509 = vst.msk [vmem:[%s835_s7] sm:$0xff] %vm508_vm5, %v640_v60 }
 0x371   :  { %v642_v61 = vpop.eup %641 }
 0x372   :  { %v644_v62 = vpop.eup %643  ;;  %511 = vst.msk [vmem:[%s835_s7 + $0x10] sm:$0xff] %vm508_vm5, %v642_v61 }
 0x373   :  { %512 = vst.msk [vmem:[%s835_s7 + $0x18] sm:$0xff] %vm508_vm5, %v644_v62 }

// kernel: forward.5
= control target key start
LH: loop header
LB: loop body
LE: loop exit
PB: predicated region body
PF: predicated region fallthrough
CT: control target
= control target key end

     0   :  { %vm24_vm0 = vcmask 261120   ;;  %v342_v2 = vmov 0.0   ;;  %s434_s0 = inlined_call_operand.vmem [shape: f32[2,16,32], index: 0, kind: input, shape index: {}]   ;;  %s435_s1 = inlined_call_operand.vmem [shape: f32[2,8,32], index: 1, kind: input, shape index: {}]   ;;  %s436_s2 = inlined_call_operand.vmem [shape: f32[64,32], index: 2, kind: input, shape index: {}]   ;;  %s437_s3 = inlined_call_operand.vmem [shape: f32[1,32], index: 3, kind: input, shape index: {}]   ;;  %s438_s4 = inlined_call_operand.hbm [shape: f32[2,32], index: 4, kind: output, shape index: {}]  }
   0x1   :  { %v102_v0 = vld [vmem:[%s436_s2 + $0x18] sm:$0xff]  ;;  %306 = vmatprep.subr.mxu1 %v342_v2  ;;  %295 = vmatprep.subr.mxu0 %v342_v2  ;;  %v101_v3 = vld [vmem:[%s436_s2 + $0x10] sm:$0xff]  ;;  %v100_v5 = vld [vmem:[%s436_s2 + $0x8] sm:$0xff] }
   0x2   :  { %v106_v1 = vld [vmem:[%s436_s2 + $0x38] sm:$0xff]  ;;  %v105_v4 = vld [vmem:[%s436_s2 + $0x30] sm:$0xff]  ;;  %307 = vmatpush3.msra.mxu1 %v102_v0  ;;  %v104_v6 = vld [vmem:[%s436_s2 + $0x28] sm:$0xff] }
   0x3   :  { %296 = vmatpush3.msra.mxu0 %v106_v1  ;;  %v18_v7 = vld [vmem:[%s434_s0] sm:$0xff]  ;;  %v19_v8 = vld [vmem:[%s434_s0 + $0x8] sm:$0xff]  ;;  %308 = vmatprep.subr.mxu1 %v342_v2  ;;  %v20_v9 = vld [vmem:[%s434_s0 + $0x10] sm:$0xff] }
   0x4   :  { %297 = vmatprep.subr.mxu0 %v342_v2  ;;  %v21_v10 = vld [vmem:[%s434_s0 + $0x18] sm:$0xff]  ;;  %v22_v11 = vld [vmem:[%s435_s1] sm:$0xff]  ;;  %v25_v12 = vsel %vm24_vm0, %v18_v7, -inf  ;;  %v26_v13 = vsel %vm24_vm0, %v19_v8, -inf  ;;  %v59_v14 = vsel %vm24_vm0, %v18_v7, 0.0  ;;  %309 = vmatpush3.msra.mxu1 %v101_v3  ;;  %v23_v15 = vld [vmem:[%s435_s1 + $0x8] sm:$0xff] }
   0x5   :  { %298 = vmatpush3.msra.mxu0 %v105_v4  ;;  %v27_v16 = vmax.f32 %v25_v12, %v26_v13  ;;  %v34_v17 = vsel %vm24_vm0, %v20_v9, -inf  ;;  %v35_v18 = vsel %vm24_vm0, %v21_v10, -inf  ;;  %v43_v19 = vsel %vm24_vm0, %v22_v11, -inf  ;;  %310 = vmatprep.subr.mxu1 %v342_v2  ;;  %v99_v20 = vld [vmem:[%s436_s2] sm:$0xff] }
   0x6   :  { %299 = vmatprep.subr.mxu0 %v342_v2  ;;  %v36_v21 = vmax.f32 %v34_v17, %v35_v18  ;;  %v44_v22 = vrot.slane %v43_v19, 4  ;;  %v50_v23 = vsel %vm24_vm0, %v23_v15, -inf  ;;  %v60_v24 = vsel %vm24_vm0, %v19_v8, 0.0 }
   0x7   :  { %9 = vsyncpa [#allocation3], 0  ;;  %311 = vmatpush3.msra.mxu1 %v100_v5  ;;  %300 = vmatpush3.msra.mxu0 %v104_v6  ;;  %v28_v25 = vrot.slane %v27_v16, 4  ;;  %v51_v26 = vrot.slane %v50_v23, 4  ;;  %v103_v27 = vld [vmem:[%s436_s2 + $0x20] sm:$0xff]  ;;  %v61_v28 = vadd.f32 %v60_v24, %v59_v14  ;;  %v68_v29 = vsel %vm24_vm0, %v20_v9, 0.0 }
   0x8   :  { %312 = vmatprep.subr.mxu1 %v342_v2  ;;  %vm343_vm1 = vmmov 0   ;;  %v37_v30 = vrot.slane %v36_v21, 4  ;;  %v45_v31 = vmax.f32 %v43_v19, %v44_v22  ;;  %v69_v32 = vsel %vm24_vm0, %v21_v10, 0.0  ;;  %301 = vmatprep.subr.mxu0 %v342_v2  ;;  %s344_s16 = smov [#allocation2]  }
   0x9   :  { %314 = vmatprep.mubr.msk.f32.mxu1 %vm343_vm1, %v342_v2  ;;  %v80_v33 = vsel %vm24_vm0, %v22_v11, 0.0  ;;  %313 = vmatpush3.msra.mxu1 %v99_v20  ;;  %v29_v34 = vmax.f32 %v27_v16, %v28_v25  ;;  %v52_v35 = vmax.f32 %v50_v23, %v51_v26  ;;  %v62_v36 = vrot.slane %v61_v28, 4  ;;  %s274_s17 = sshll.u32 %s344_s16, 4  ;;  %s275_s17 = int_to_ptr.vmem [resolvable:$true] %s274_s17 }
   0xa   :  { %v70_v37 = vadd.f32 %v69_v32, %v68_v29  ;;  %v38_v38 = vmax.f32 %v36_v21, %v37_v30  ;;  %v46_v39 = vrot.slane %v45_v31, 2  ;;  %302 = vmatpush3.msra.mxu0 %v103_v27  ;;  %303 = vmatprep.mubr.msk.f32.mxu0 %vm343_vm1, %v342_v2  ;;  %v81_v40 = vrot.slane %v80_v33, 4  ;;  %s320_s18 = scalar_lea.vmem %s275_s17, 32  ;;  %p325_p1 = scmp.lt.s32.totalorder %s275_s17, %s275_s17 }
   0xb   :  { %v87_v41 = vsel %vm24_vm0, %v23_v15, 0.0  ;;  %v30_v42 = vrot.slane %v29_v34, 2  ;;  %v53_v43 = vrot.slane %v52_v35, 2  ;;  %v63_v44 = vadd.f32 %v62_v36, %v61_v28  ;;  %v284_v28 = vld [vmem:[%s437_s3] ss:$0 sm:$0xff]  ;;  %p321_p0 = scmp.ne.s32.totalorder %s275_s17, %s320_s18  ;;  %p326_p2 = scmp.lt.s32.totalorder %s320_s18, %s320_s18 }
   0xc   :  { %v71_v45 = vrot.slane %v70_v37, 4  ;;  %v39_v46 = vrot.slane %v38_v38, 2  ;;  %v47_v47 = vmax.f32 %v45_v31, %v46_v39  ;;  %v82_v48 = vadd.f32 %v81_v40, %v80_v33 }
   0xd   :  { %v88_v49 = vrot.slane %v87_v41, 4  ;;  %v31_v50 = vmax.f32 %v29_v34, %v30_v42  ;;  %v54_v51 = vmax.f32 %v52_v35, %v53_v43  ;;  %v64_v52 = vrot.slane %v63_v44, 2  ;;  %p327_p3 = por %p326_p2, %p325_p1 }
   0xe   :  { %v72_v53 = vadd.f32 %v71_v45, %v70_v37  ;;  %v40_v54 = vmax.f32 %v38_v38, %v39_v46  ;;  %v48_v55 = vrot.slane %v47_v47, 1  ;;  %v83_v56 = vrot.slane %v82_v48, 2 }
   0xf   :  { %v89_v57 = vadd.f32 %v88_v49, %v87_v41  ;;  %v32_v58 = vrot.slane %v31_v50, 1  ;;  %v55_v59 = vrot.slane %v54_v51, 1  ;;  %v65_v60 = vadd.f32 %v64_v52, %v63_v44  ;;  %p328_p4 = pnand %p327_p3, %p321_p0 }
  0x10   :  { %v73_v61 = vrot.slane %v72_v53, 2  ;;  %v41_v62 = vrot.slane %v40_v54, 1  ;;  %v49_v63 = vmax.f32 %v47_v47, %v48_v55  ;;  %v84_v0 = vadd.f32 %v83_v56, %v82_v48 }
  0x11   :  { %v90_v1 = vrot.slane %v89_v57, 2  ;;  %v33_v2 = vmax.f32 %v31_v50, %v32_v58  ;;  %v56_v3 = vmax.f32 %v54_v51, %v55_v59  ;;  %v66_v4 = vrot.slane %v65_v60, 1 }
  0x12   :  { %v74_v5 = vadd.f32 %v73_v61, %v72_v53  ;;  %v42_v6 = vmax.f32 %v40_v54, %v41_v62  ;;  %v85_v7 = vrot.slane %v84_v0, 1  ;;  %vm109_vm2 = vcmask 1041409  }
  0x13   :  { %v91_v8 = vadd.f32 %v90_v1, %v89_v57  ;;  %v57_v9 = vadd.f32 %v49_v63, %v33_v2  ;;  %v67_v10 = vadd.f32 %v66_v4, %v65_v60  ;;  %vm266_vm3 = vcmask 254976  }
  0x14   :  { %v75_v11 = vrot.slane %v74_v5, 1  ;;  %v58_v12 = vadd.f32 %v56_v3, %v42_v6  ;;  %v86_v13 = vadd.f32 %v85_v7, %v84_v0 }
  0x15   :  { %v92_v14 = vrot.slane %v91_v8, 1  ;;  %v78_v16 = vmul.f32 0.0625, %v67_v10 }
  0x16   :  { %v76_v15 = vadd.f32 %v75_v11, %v74_v5  ;;  %v185_v17 = vsel %vm109_vm2, %v58_v12, %v57_v9  ;;  %v95_v19 = vmul.f32 0.125, %v86_v13 }
  0x17   :  { %v93_v18 = vadd.f32 %v92_v14, %v91_v8  ;;  %315 = vmatmul.mubr.msk.f32.vlgmr.msra.gmra.mxu1 %vm24_vm0, %v185_v17 }
  0x18   :  { %v79_v20 = vmul.f32 0.0625, %v76_v15  ;;  %v97_v22 = vadd.f32 %v95_v19, %v78_v16 }
  0x19   :  { %v96_v21 = vmul.f32 0.125, %v93_v18 }
  0x1b   :  { %v98_v23 = vadd.f32 %v96_v21, %v79_v20 }
  0x1d   :  { %v110_v24 = vsel %vm109_vm2, %v98_v23, %v97_v22 }
  0x1e   :  { %304 = vmatmul.mubr.msk.f32.vlgmr.msra.gmra.mxu0 %vm24_vm0, %v110_v24 }
  0xd7   :  { %v254_v25 = vpop.f32.mrf.mxu1 }
  0xd9   :  { %v316_v26 = vpop.f32.mrf.mxu1 }
  0xde   :  { %v179_v27 = vpop.f32.mrf.mxu0 }
  0xdf   :  { %v255_v29 = vadd.f32 %v254_v25, %v179_v27 }
  0xe0   :  { %v305_v30 = vpop.f32.mrf.mxu0 }
  0xe1   :  { %v265_v31 = vadd.f32 %v284_v28, %v255_v29 }
  0xe3   :  { %267 = vst.msk [vmem:[#allocation2] sm:$0x3] %vm266_vm3, %v265_v31 }
  0xe4   :  { %331 = shalt.err (!%p328_p4)
}
  0xe5   :  { %277 = dma.vmem_to_hbm [thread:$0]  %s275_s17, 32, %s438_s4, [#allocation3]  }
  0xe6   :  { %340 = dma.done.wait [#allocation3], 32  }
  0xe7   :  { %341 = vsyncadd [#allocation3], 4294967264 }
  0xe8   :  { %281 = vsyncpa [#allocation3], 1 }

</bundles_post_ra>
